<compile_context>
chip_gen: v7x
topology: tpu7x:2x2x1
jax: 0.10.0
libtpu: 0.0.40
codegen_flags: <defaults>
</compile_context>

<pallas_src>
import functools
import math

import jax
import jax.numpy as jnp
from jax import lax
from jax.experimental import pallas as pl
from jax.experimental.pallas import tpu as pltpu

EPS = 1e-5
_VMEM_LIMIT = 32 * 1024 * 1024  # within the scoped-VMEM default on every gen
_MAX_TM = 512                   # rows per matmul tile
_MAX_TK = 2048                  # K slab per matmul grid step
_EW_BLOCK_BYTES = 2 * 1024 * 1024  # target f32 bytes per elementwise operand block


# ---------------------------------------------------------------------------
# Tiling helpers
# ---------------------------------------------------------------------------
def _round_up(x, m):
    return (x + m - 1) // m * m


def _pick_tm(m):
    """Row tile (multiple of 128, prefers >=2 tiles for megacore) + padded M."""
    mp128 = _round_up(m, 128)
    tm = min(_MAX_TM, mp128)
    if mp128 // tm < 2 and tm > 128:           # give both v7x TCs work
        tm = max(128, _round_up(mp128 // 2, 128))
    mp = _round_up(m, tm)
    return tm, mp


def _elementwise_plan(mp, c):
    """Lane-dense repack plan for the fused elementwise kernels.

    (mp, c) row-major is reshaped (free) to (rows, lanes) with lanes = r*c a
    multiple of 128 (>=512 when divisibility allows) and te rows per block
    (~2 MiB operand blocks, multiple of 8, dividing rows).
    """
    r = 128 // math.gcd(c, 128)                # smallest r with (r*c) % 128 == 0
    while r * c < 512 and mp % (r * 2) == 0:   # widen toward >=512 lanes
        r *= 2
    lanes = r * c
    rows = mp // r
    te = max(8, min(rows, _EW_BLOCK_BYTES // (lanes * 4)))
    te -= te % 8
    while te >= 8 and rows % te != 0:
        te -= 8
    if te < 8:
        te = rows                              # single block (equals full dim)
    return r, lanes, rows, te


def _pad_rows(a, mp):
    m = a.shape[0]
    if m == mp:
        return a
    return jnp.pad(a, ((0, mp - m), (0, 0)))


# ---------------------------------------------------------------------------
# Pallas kernels
# ---------------------------------------------------------------------------
def _matmul_stats_kernel(a_ref, b_ref, y_ref, stat_ref, acc_ref):
    """y = A @ B (bf16 operands, f32 acc over the K grid axis) + BN partials."""
    @pl.when(pl.program_id(1) == 0)
    def _():
        acc_ref[...] = jnp.zeros_like(acc_ref)

    acc_ref[...] += jnp.dot(a_ref[...], b_ref[...],
                            preferred_element_type=jnp.float32)

    @pl.when(pl.program_id(1) == pl.num_programs(1) - 1)
    def _():
        acc = acc_ref[...]
        y_ref[...] = acc.astype(y_ref.dtype)                      # bf16 store
        stat_ref[0:1, :] = jnp.sum(acc, axis=0, keepdims=True)     # per-tile sum
        stat_ref[1:2, :] = jnp.sum(acc * acc, axis=0, keepdims=True)
        # rows 2..7 of the stat block are never read downstream.


def _bn_relu_kernel(y_ref, s_ref, b_ref, o_ref):
    y = y_ref[...].astype(jnp.float32)                 # f32 compute (v5e VPU)
    o_ref[...] = jnp.maximum(y * s_ref[...] + b_ref[...], 0.0).astype(o_ref.dtype)


def _bn_add_relu_kernel(y_ref, s_ref, b_ref, r_ref, o_ref):
    # main BN + identity residual + ReLU
    y = y_ref[...].astype(jnp.float32)
    res = r_ref[...].astype(jnp.float32)
    o_ref[...] = jnp.maximum(y * s_ref[...] + b_ref[...] + res, 0.0
                             ).astype(o_ref.dtype)


def _double_bn_add_relu_kernel(y_ref, s_ref, b_ref, ys_ref, ss_ref, bs_ref, o_ref):
    # main BN + shortcut BN + residual + ReLU, all fused
    y = y_ref[...].astype(jnp.float32)
    ys = ys_ref[...].astype(jnp.float32)
    o_ref[...] = jnp.maximum(
        y * s_ref[...] + b_ref[...] + ys * ss_ref[...] + bs_ref[...], 0.0
    ).astype(o_ref.dtype)


# ---------------------------------------------------------------------------
# Pallas call wrappers
# ---------------------------------------------------------------------------
def matmul_with_stats(a, b, *, tm):
    """a: (Mp, K) bf16 (tail rows zero-padded), b: (K, N) bf16.

    Returns y (Mp, N) bf16 plus per-column sum / sum-of-squares of the f32
    accumulator (zero-padded rows/columns contribute 0).
    """
    mp, k = a.shape
    kb, n = b.shape
    assert k == kb and mp % tm == 0
    num_m = mp // tm

    # K tiling keeps per-step VMEM small (v7x-friendly); pad K if needed.
    num_k = max(1, -(-k // _MAX_TK))
    if num_k == 1:
        tk = k
    else:
        tk = _round_up(-(-k // num_k), 128)
        kp = tk * num_k
        if kp != k:
            a = jnp.pad(a, ((0, 0), (0, kp - k)))
            b = jnp.pad(b, ((0, kp - k), (0, 0)))

    y, part = pl.pallas_call(
        _matmul_stats_kernel,
        out_shape=(
            jax.ShapeDtypeStruct((mp, n), jnp.bfloat16),
            jax.ShapeDtypeStruct((num_m * 8, n), jnp.float32),
        ),
        grid=(num_m, num_k),
        in_specs=[
            pl.BlockSpec((tm, tk), lambda i, j: (i, j)),
            pl.BlockSpec((tk, n), lambda i, j: (j, 0)),
        ],
        out_specs=(
            pl.BlockSpec((tm, n), lambda i, j: (i, 0)),
            pl.BlockSpec((8, n), lambda i, j: (i, 0)),
        ),
        scratch_shapes=[pltpu.VMEM((tm, n), jnp.float32)],
        compiler_params=pltpu.CompilerParams(
            dimension_semantics=("parallel", "arbitrary"),
            vmem_limit_bytes=_VMEM_LIMIT,
        ),
    )(a, b)
    part = part.reshape(num_m, 8, n)
    col_sum = jnp.sum(part[:, 0, :], axis=0)
    col_sumsq = jnp.sum(part[:, 1, :], axis=0)
    return y, col_sum, col_sumsq


def _elementwise_call(kernel, operands, *, m_valid, c, out_dtype):
    """Fused per-channel affine / residual / ReLU on a lane-dense repack.

    operands: ordered list of ("mat", (Mp, C) bf16/f32) or ("vec", (C,) f32).
    Matrices are reshaped (free, row-major) to (rows, lanes); vectors are
    tiled to a (1, lanes) resident block.
    """
    mp = next(arr.shape[0] for kind, arr in operands if kind == "mat")
    r, lanes, rows, te = _elementwise_plan(mp, c)

    in_specs, args = [], []
    for kind, arr in operands:
        if kind == "mat":
            args.append(arr.reshape(rows, lanes))
            in_specs.append(pl.BlockSpec((te, lanes), lambda i: (i, 0)))
        else:
            args.append(jnp.tile(arr.astype(jnp.float32), r).reshape(1, lanes))
            in_specs.append(pl.BlockSpec((1, lanes), lambda i: (0, 0)))

    out = pl.pallas_call(
        kernel,
        out_shape=jax.ShapeDtypeStruct((rows, lanes), out_dtype),
        grid=(rows // te,),
        in_specs=in_specs,
        out_specs=pl.BlockSpec((te, lanes), lambda i: (i, 0)),
        compiler_params=pltpu.CompilerParams(
            dimension_semantics=("parallel",),
            vmem_limit_bytes=_VMEM_LIMIT,
        ),
    )(*args)
    return out.reshape(mp, c)[:m_valid]


# ---------------------------------------------------------------------------
# Glue: im2col, BN folding, parameter setup
# ---------------------------------------------------------------------------
def im2col_3x3(x_nhwc, stride):
    """NHWC -> (N*Ho*Wo, 9*C) patches, pad=1, kernel=3 (dtype preserved)."""
    N, H, W, C = x_nhwc.shape
    xp = jnp.pad(x_nhwc, ((0, 0), (1, 1), (1, 1), (0, 0)))
    Ho = (H + 2 - 3) // stride + 1
    Wo = (W + 2 - 3) // stride + 1
    taps = []
    for dy in range(3):
        for dx in range(3):
            taps.append(
                xp[:,
                   dy: dy + stride * (Ho - 1) + 1: stride,
                   dx: dx + stride * (Wo - 1) + 1: stride,
                   :])
    patches = jnp.concatenate(taps, axis=-1)  # (N, Ho, Wo, 9*C)
    return patches.reshape(N * Ho * Wo, 9 * C), (N, Ho, Wo)


def conv3x3_w_to_mat(w):
    """PyTorch (Cout, Cin, 3, 3) -> (9*Cin, Cout) matching im2col tap order."""
    cout, cin, _, _ = w.shape
    return jnp.transpose(w, (2, 3, 1, 0)).reshape(9 * cin, cout)


def _fold_bn(col_sum, col_sumsq, count, gamma, beta):
    """Train-mode BN (biased batch stats) folded to per-channel scale/bias."""
    count = jnp.float32(count)
    mean = col_sum / count
    var = jnp.maximum(col_sumsq / count - mean * mean, 0.0)
    scale = gamma * lax.rsqrt(var + EPS)
    bias = beta - mean * scale
    return scale, bias


def init_basic_block_params(key, in_planes, planes, stride):
    keys = jax.random.split(key, 3)
    params = {
        "conv1_w": 0.1 * jax.random.normal(keys[0], (planes, in_planes, 3, 3), jnp.float32),
        "bn1_g": jnp.ones((planes,), jnp.float32),
        "bn1_b": jnp.zeros((planes,), jnp.float32),
        "conv2_w": 0.1 * jax.random.normal(keys[1], (planes, planes, 3, 3), jnp.float32),
        "bn2_g": jnp.ones((planes,), jnp.float32),
        "bn2_b": jnp.zeros((planes,), jnp.float32),
    }
    if stride != 1 or in_planes != planes:
        params["convs_w"] = 0.1 * jax.random.normal(
            keys[2], (planes, in_planes, 1, 1), jnp.float32)
        params["bns_g"] = jnp.ones((planes,), jnp.float32)
        params["bns_b"] = jnp.zeros((planes,), jnp.float32)
    return params


# ---------------------------------------------------------------------------
# Forward pass
# ---------------------------------------------------------------------------
@functools.partial(jax.jit, static_argnames=("stride",))
def basic_block_forward(x_nchw, params, stride):
    in_planes = x_nchw.shape[1]
    planes = params["conv1_w"].shape[0]
    x_bf = jnp.transpose(x_nchw, (0, 2, 3, 1)).astype(jnp.bfloat16)  # NHWC bf16

    # conv1 (3x3, stride) with fused bn1 batch-stat partials
    p1, (N, Ho, Wo) = im2col_3x3(x_bf, stride)
    M = N * Ho * Wo
    tm, mp = _pick_tm(M)
    p1 = _pad_rows(p1, mp)
    w1 = conv3x3_w_to_mat(params["conv1_w"]).astype(jnp.bfloat16)
    y1, s1, sq1 = matmul_with_stats(p1, w1, tm=tm)               # bf16 y
    sc1, b1 = _fold_bn(s1, sq1, M, params["bn1_g"], params["bn1_b"])
    out1 = _elementwise_call(
        _bn_relu_kernel,
        [("mat", y1), ("vec", sc1), ("vec", b1)],
        m_valid=M, c=planes, out_dtype=jnp.bfloat16)             # bf16 activation
    out1_nhwc = out1.reshape(N, Ho, Wo, planes)

    # conv2 (3x3, stride 1) with fused bn2 batch-stat partials
    p2, _ = im2col_3x3(out1_nhwc, 1)
    p2 = _pad_rows(p2, mp)
    w2 = conv3x3_w_to_mat(params["conv2_w"]).astype(jnp.bfloat16)
    y2, s2, sq2 = matmul_with_stats(p2, w2, tm=tm)
    sc2, b2 = _fold_bn(s2, sq2, M, params["bn2_g"], params["bn2_b"])

    if stride != 1 or in_planes != planes:
        # 1x1 strided shortcut conv + its BN, all folded into the final kernel
        xs = x_bf[:, ::stride, ::stride, :].reshape(M, in_planes)
        xs = _pad_rows(xs, mp)
        ws = params["convs_w"].reshape(planes, in_planes).T.astype(jnp.bfloat16)
        ys, ss, sqs = matmul_with_stats(xs, ws, tm=tm)           # bf16 ys
        scs, bs = _fold_bn(ss, sqs, M, params["bns_g"], params["bns_b"])
        out = _elementwise_call(
            _double_bn_add_relu_kernel,
            [("mat", y2), ("vec", sc2), ("vec", b2),
             ("mat", ys), ("vec", scs), ("vec", bs)],
            m_valid=M, c=planes, out_dtype=jnp.float32)
    else:
        res = _pad_rows(x_bf.reshape(M, planes), mp)             # bf16 residual
        out = _elementwise_call(
            _bn_add_relu_kernel,
            [("mat", y2), ("vec", sc2), ("vec", b2), ("mat", res)],
            m_valid=M, c=planes, out_dtype=jnp.float32)

    out = out.reshape(N, Ho, Wo, planes)
    return jnp.transpose(out, (0, 3, 1, 2))  # back to NCHW


# ---------------------------------------------------------------------------
# Pure-JAX reference (fp32 lax conv) for the sanity check
# ---------------------------------------------------------------------------
def reference_forward(x_nchw, params, stride):
    def conv(x, w, s):
        return lax.conv_general_dilated(
            x, w, window_strides=(s, s),
            padding=[(w.shape[2] // 2,) * 2, (w.shape[3] // 2,) * 2],
            dimension_numbers=("NCHW", "OIHW", "NCHW"))

    def bn(y, g, b):
        mean = jnp.mean(y, axis=(0, 2, 3), keepdims=True)
        var = jnp.mean((y - mean) ** 2, axis=(0, 2, 3), keepdims=True)
        return (y - mean) / jnp.sqrt(var + EPS) * g[None, :, None, None] + b[None, :, None, None]

    in_planes = x_nchw.shape[1]
    planes = params["conv1_w"].shape[0]
    out = jax.nn.relu(bn(conv(x_nchw, params["conv1_w"], stride), params["bn1_g"], params["bn1_b"]))
    out = bn(conv(out, params["conv2_w"], 1), params["bn2_g"], params["bn2_b"])
    if stride != 1 or in_planes != planes:
        sc = bn(conv(x_nchw, params["convs_w"], stride), params["bns_g"], params["bns_b"])
    else:
        sc = x_nchw
    return jax.nn.relu(out + sc)


if __name__ == "__main__":
    key = jax.random.PRNGKey(0)
    k_x, k_p, k_x2, k_p2 = jax.random.split(key, 4)

    # 1) downsampling block: stride 2, channel expansion (conv+BN shortcut path)
    batch, in_planes, planes, spatial, stride = 2, 4, 8, 16, 2
    x = jax.random.normal(k_x, (batch, in_planes, spatial, spatial), jnp.float32)
    params = init_basic_block_params(k_p, in_planes, planes, stride)
    out = jax.block_until_ready(basic_block_forward(x, params, stride))
    ref = reference_forward(x, params, stride)
    assert out.shape == ref.shape == (batch, planes, spatial // stride, spatial // stride)
    # bf16 matmul operands + bf16 intermediates -> loose tolerance vs fp32 ref
    assert jnp.allclose(out, ref, atol=6e-2, rtol=6e-2), "mismatch (downsample block)"

    # 2) identity block: stride 1, same channels (identity shortcut path)
    x2 = jax.random.normal(k_x2, (batch, planes, spatial, spatial), jnp.float32)
    params2 = init_basic_block_params(k_p2, planes, planes, 1)
    out2 = jax.block_until_ready(basic_block_forward(x2, params2, 1))
    ref2 = reference_forward(x2, params2, 1)
    assert out2.shape == ref2.shape == (batch, planes, spatial, spatial)
    assert jnp.allclose(out2, ref2, atol=6e-2, rtol=6e-2), "mismatch (identity block)"

    print("KERNEL_OK")
</pallas_src>

<mosaic_0001>
module attributes {stable_mosaic.version = 11 : i64} {
  func.func @_matmul_stats_kernel(%arg0: i32, %arg1: i32, %arg2: memref<128x36xbf16, #tpu.memory_space<vmem>>, %arg3: memref<36x8xbf16, #tpu.memory_space<vmem>>, %arg4: memref<128x8xbf16, #tpu.memory_space<vmem>>, %arg5: memref<8x8xf32, #tpu.memory_space<vmem>>, %arg6: memref<128x8xf32, #tpu.memory_space<vmem>>) attributes {dimension_semantics = [#tpu.dimension_semantics<parallel>, #tpu.dimension_semantics<arbitrary>], iteration_bounds = array<i64: 1, 1>, scalar_prefetch = 0 : i64, scratch_operands = 1 : i64, tpu.core_type = #tpu.core_type<tc>, window_params = [{transform_indices = @transform_0, window_bounds = array<i64: 128, 36>}, {transform_indices = @transform_1, window_bounds = array<i64: 36, 8>}, {transform_indices = @transform_2, window_bounds = array<i64: 128, 8>}, {transform_indices = @transform_3, window_bounds = array<i64: 8, 8>}]} {
    %c0_i32 = arith.constant 0 : i32
    %0 = arith.cmpi eq, %arg1, %c0_i32 : i32
    %1 = arith.extui %0 : i1 to i32
    %c0_i32_0 = arith.constant 0 : i32
    %2 = arith.cmpi ne, %1, %c0_i32_0 : i32
    scf.if %2 {
      %cst_10 = arith.constant 0.000000e+00 : f32
      %12 = vector.broadcast %cst_10 : f32 to vector<128x8xf32>
      %c0_11 = arith.constant 0 : index
      %c0_12 = arith.constant 0 : index
      %13 = vector.load %arg6[%c0_11, %c0_12] : memref<128x8xf32, #tpu.memory_space<vmem>>, vector<128x8xf32>
      tpu.vector_store %arg6[%c0_11, %c0_12], %12 {strides = array<i32>} : memref<128x8xf32, #tpu.memory_space<vmem>>, vector<128x8xf32>,
    } else {
    }
    %c0 = arith.constant 0 : index
    %c0_1 = arith.constant 0 : index
    %3 = vector.load %arg6[%c0, %c0_1] : memref<128x8xf32, #tpu.memory_space<vmem>>, vector<128x8xf32>
    %c0_2 = arith.constant 0 : index
    %c0_3 = arith.constant 0 : index
    %4 = vector.load %arg2[%c0_2, %c0_3] : memref<128x36xbf16, #tpu.memory_space<vmem>>, vector<128x36xbf16>
    %c0_4 = arith.constant 0 : index
    %c0_5 = arith.constant 0 : index
    %5 = vector.load %arg3[%c0_4, %c0_5] : memref<36x8xbf16, #tpu.memory_space<vmem>>, vector<36x8xbf16>
    %cst = arith.constant dense<0.000000e+00> : vector<128x8xf32>
    %6 = tpu.matmul %4, %5, %cst {dimension_numbers = #tpu.dot_dimension_numbers<[1], [0], [0], [1], [0, 0, 1, 1], [], []>} : vector<128x36xbf16>, vector<36x8xbf16>, vector<128x8xf32> -> vector<128x8xf32>
    %7 = arith.addf %3, %6 : vector<128x8xf32>
    %c0_6 = arith.constant 0 : index
    %c0_7 = arith.constant 0 : index
    %8 = vector.load %arg6[%c0_6, %c0_7] : memref<128x8xf32, #tpu.memory_space<vmem>>, vector<128x8xf32>
    tpu.vector_store %arg6[%c0_6, %c0_7], %7 {strides = array<i32>} : memref<128x8xf32, #tpu.memory_space<vmem>>, vector<128x8xf32>,
    %c0_i32_8 = arith.constant 0 : i32
    %9 = arith.cmpi eq, %arg1, %c0_i32_8 : i32
    %10 = arith.extui %9 : i1 to i32
    %c0_i32_9 = arith.constant 0 : i32
    %11 = arith.cmpi ne, %10, %c0_i32_9 : i32
    scf.if %11 {
      %c0_10 = arith.constant 0 : index
      %c0_11 = arith.constant 0 : index
      %12 = vector.load %arg6[%c0_10, %c0_11] : memref<128x8xf32, #tpu.memory_space<vmem>>, vector<128x8xf32>
      %13 = arith.truncf %12 : vector<128x8xf32> to vector<128x8xbf16>
      %c0_12 = arith.constant 0 : index
      %c0_13 = arith.constant 0 : index
      %14 = vector.load %arg4[%c0_12, %c0_13] : memref<128x8xbf16, #tpu.memory_space<vmem>>, vector<128x8xbf16>
      tpu.vector_store %arg4[%c0_12, %c0_13], %13 {strides = array<i32>} : memref<128x8xbf16, #tpu.memory_space<vmem>>, vector<128x8xbf16>,
      %cst_14 = arith.constant dense<0.000000e+00> : vector<8xf32>
      %15 = vector.multi_reduction <add>, %12, %cst_14 [0] : vector<128x8xf32> to vector<8xf32>
      %16 = vector.shape_cast %15 : vector<8xf32> to vector<1x8xf32>
      %c0_15 = arith.constant 0 : index
      %c0_16 = arith.constant 0 : index
      %17 = vector.load %arg5[%c0_15, %c0_16] : memref<8x8xf32, #tpu.memory_space<vmem>>, vector<1x8xf32>
      tpu.vector_store %arg5[%c0_15, %c0_16], %16 {strides = array<i32>} : memref<8x8xf32, #tpu.memory_space<vmem>>, vector<1x8xf32>,
      %18 = arith.mulf %12, %12 : vector<128x8xf32>
      %cst_17 = arith.constant dense<0.000000e+00> : vector<8xf32>
      %19 = vector.multi_reduction <add>, %18, %cst_17 [0] : vector<128x8xf32> to vector<8xf32>
      %20 = vector.shape_cast %19 : vector<8xf32> to vector<1x8xf32>
      %c1 = arith.constant 1 : index
      %c0_18 = arith.constant 0 : index
      %21 = vector.load %arg5[%c1, %c0_18] : memref<8x8xf32, #tpu.memory_space<vmem>>, vector<1x8xf32>
      tpu.vector_store %arg5[%c1, %c0_18], %20 {strides = array<i32>} : memref<8x8xf32, #tpu.memory_space<vmem>>, vector<1x8xf32>,
    } else {
    }
    return
  }
  func.func @transform_0(%arg0: i32, %arg1: i32) -> (i32, i32) {
    %c0_i32 = arith.constant 0 : i32
    return %arg0, %arg1 : i32, i32
  }
  func.func @transform_1(%arg0: i32, %arg1: i32) -> (i32, i32) {
    %c0_i32 = arith.constant 0 : i32
    %c0_i32_0 = arith.constant 0 : i32
    return %arg1, %c0_i32 : i32, i32
  }
  func.func @transform_2(%arg0: i32, %arg1: i32) -> (i32, i32) {
    %c0_i32 = arith.constant 0 : i32
    %c0_i32_0 = arith.constant 0 : i32
    return %arg0, %c0_i32 : i32, i32
  }
  func.func @transform_3(%arg0: i32, %arg1: i32) -> (i32, i32) {
    %c0_i32 = arith.constant 0 : i32
    %c0_i32_0 = arith.constant 0 : i32
    return %arg0, %c0_i32 : i32, i32
  }
}

module attributes {stable_mosaic.version = 11 : i64} {
  func.func @_bn_relu_kernel(%arg0: i32, %arg1: memref<2x512xbf16, #tpu.memory_space<vmem>>, %arg2: memref<1x512xf32, #tpu.memory_space<vmem>>, %arg3: memref<1x512xf32, #tpu.memory_space<vmem>>, %arg4: memref<2x512xbf16, #tpu.memory_space<vmem>>) attributes {dimension_semantics = [#tpu.dimension_semantics<parallel>], iteration_bounds = array<i64: 1>, scalar_prefetch = 0 : i64, scratch_operands = 0 : i64, tpu.core_type = #tpu.core_type<tc>, window_params = [{transform_indices = @transform_0, window_bounds = array<i64: 2, 512>}, {pipeline_mode = #tpu.pipeline_mode<synchronous>, transform_indices = @transform_1, window_bounds = array<i64: 1, 512>}, {pipeline_mode = #tpu.pipeline_mode<synchronous>, transform_indices = @transform_2, window_bounds = array<i64: 1, 512>}, {transform_indices = @transform_3, window_bounds = array<i64: 2, 512>}]} {
    %c0 = arith.constant 0 : index
    %c0_0 = arith.constant 0 : index
    %0 = vector.load %arg1[%c0, %c0_0] : memref<2x512xbf16, #tpu.memory_space<vmem>>, vector<2x512xbf16>
    %1 = arith.extf %0 : vector<2x512xbf16> to vector<2x512xf32>
    %c0_1 = arith.constant 0 : index
    %c0_2 = arith.constant 0 : index
    %2 = vector.load %arg2[%c0_1, %c0_2] : memref<1x512xf32, #tpu.memory_space<vmem>>, vector<1x512xf32>
    %3 = vector.broadcast %2 : vector<1x512xf32> to vector<2x512xf32>
    %4 = arith.mulf %1, %3 : vector<2x512xf32>
    %c0_3 = arith.constant 0 : index
    %c0_4 = arith.constant 0 : index
    %5 = vector.load %arg3[%c0_3, %c0_4] : memref<1x512xf32, #tpu.memory_space<vmem>>, vector<1x512xf32>
    %6 = vector.broadcast %5 : vector<1x512xf32> to vector<2x512xf32>
    %7 = arith.addf %4, %6 : vector<2x512xf32>
    %cst = arith.constant 0.000000e+00 : f32
    %8 = vector.broadcast %cst : f32 to vector<2x512xf32>
    %9 = arith.maximumf %7, %8 : vector<2x512xf32>
    %10 = arith.truncf %9 : vector<2x512xf32> to vector<2x512xbf16>
    %c0_5 = arith.constant 0 : index
    %c0_6 = arith.constant 0 : index
    %11 = vector.load %arg4[%c0_5, %c0_6] : memref<2x512xbf16, #tpu.memory_space<vmem>>, vector<2x512xbf16>
    tpu.vector_store %arg4[%c0_5, %c0_6], %10 {strides = array<i32>} : memref<2x512xbf16, #tpu.memory_space<vmem>>, vector<2x512xbf16>,
    return
  }
  func.func @transform_0(%arg0: i32) -> (i32, i32) {
    %c0_i32 = arith.constant 0 : i32
    %c0_i32_0 = arith.constant 0 : i32
    return %arg0, %c0_i32 : i32, i32
  }
  func.func @transform_1(%arg0: i32) -> (i32, i32) {
    %c0_i32 = arith.constant 0 : i32
    %c0_i32_0 = arith.constant 0 : i32
    %c0_i32_1 = arith.constant 0 : i32
    return %c0_i32, %c0_i32_0 : i32, i32
  }
  func.func @transform_2(%arg0: i32) -> (i32, i32) {
    %c0_i32 = arith.constant 0 : i32
    %c0_i32_0 = arith.constant 0 : i32
    %c0_i32_1 = arith.constant 0 : i32
    return %c0_i32, %c0_i32_0 : i32, i32
  }
  func.func @transform_3(%arg0: i32) -> (i32, i32) {
    %c0_i32 = arith.constant 0 : i32
    %c0_i32_0 = arith.constant 0 : i32
    return %arg0, %c0_i32 : i32, i32
  }
}

module attributes {stable_mosaic.version = 11 : i64} {
  func.func @_matmul_stats_kernel(%arg0: i32, %arg1: i32, %arg2: memref<128x72xbf16, #tpu.memory_space<vmem>>, %arg3: memref<72x8xbf16, #tpu.memory_space<vmem>>, %arg4: memref<128x8xbf16, #tpu.memory_space<vmem>>, %arg5: memref<8x8xf32, #tpu.memory_space<vmem>>, %arg6: memref<128x8xf32, #tpu.memory_space<vmem>>) attributes {dimension_semantics = [#tpu.dimension_semantics<parallel>, #tpu.dimension_semantics<arbitrary>], iteration_bounds = array<i64: 1, 1>, scalar_prefetch = 0 : i64, scratch_operands = 1 : i64, tpu.core_type = #tpu.core_type<tc>, window_params = [{transform_indices = @transform_0, window_bounds = array<i64: 128, 72>}, {transform_indices = @transform_1, window_bounds = array<i64: 72, 8>}, {transform_indices = @transform_2, window_bounds = array<i64: 128, 8>}, {transform_indices = @transform_3, window_bounds = array<i64: 8, 8>}]} {
    %c0_i32 = arith.constant 0 : i32
    %0 = arith.cmpi eq, %arg1, %c0_i32 : i32
    %1 = arith.extui %0 : i1 to i32
    %c0_i32_0 = arith.constant 0 : i32
    %2 = arith.cmpi ne, %1, %c0_i32_0 : i32
    scf.if %2 {
      %cst_10 = arith.constant 0.000000e+00 : f32
      %12 = vector.broadcast %cst_10 : f32 to vector<128x8xf32>
      %c0_11 = arith.constant 0 : index
      %c0_12 = arith.constant 0 : index
      %13 = vector.load %arg6[%c0_11, %c0_12] : memref<128x8xf32, #tpu.memory_space<vmem>>, vector<128x8xf32>
      tpu.vector_store %arg6[%c0_11, %c0_12], %12 {strides = array<i32>} : memref<128x8xf32, #tpu.memory_space<vmem>>, vector<128x8xf32>,
    } else {
    }
    %c0 = arith.constant 0 : index
    %c0_1 = arith.constant 0 : index
    %3 = vector.load %arg6[%c0, %c0_1] : memref<128x8xf32, #tpu.memory_space<vmem>>, vector<128x8xf32>
    %c0_2 = arith.constant 0 : index
    %c0_3 = arith.constant 0 : index
    %4 = vector.load %arg2[%c0_2, %c0_3] : memref<128x72xbf16, #tpu.memory_space<vmem>>, vector<128x72xbf16>
    %c0_4 = arith.constant 0 : index
    %c0_5 = arith.constant 0 : index
    %5 = vector.load %arg3[%c0_4, %c0_5] : memref<72x8xbf16, #tpu.memory_space<vmem>>, vector<72x8xbf16>
    %cst = arith.constant dense<0.000000e+00> : vector<128x8xf32>
    %6 = tpu.matmul %4, %5, %cst {dimension_numbers = #tpu.dot_dimension_numbers<[1], [0], [0], [1], [0, 0, 1, 1], [], []>} : vector<128x72xbf16>, vector<72x8xbf16>, vector<128x8xf32> -> vector<128x8xf32>
    %7 = arith.addf %3, %6 : vector<128x8xf32>
    %c0_6 = arith.constant 0 : index
    %c0_7 = arith.constant 0 : index
    %8 = vector.load %arg6[%c0_6, %c0_7] : memref<128x8xf32, #tpu.memory_space<vmem>>, vector<128x8xf32>
    tpu.vector_store %arg6[%c0_6, %c0_7], %7 {strides = array<i32>} : memref<128x8xf32, #tpu.memory_space<vmem>>, vector<128x8xf32>,
    %c0_i32_8 = arith.constant 0 : i32
    %9 = arith.cmpi eq, %arg1, %c0_i32_8 : i32
    %10 = arith.extui %9 : i1 to i32
    %c0_i32_9 = arith.constant 0 : i32
    %11 = arith.cmpi ne, %10, %c0_i32_9 : i32
    scf.if %11 {
      %c0_10 = arith.constant 0 : index
      %c0_11 = arith.constant 0 : index
      %12 = vector.load %arg6[%c0_10, %c0_11] : memref<128x8xf32, #tpu.memory_space<vmem>>, vector<128x8xf32>
      %13 = arith.truncf %12 : vector<128x8xf32> to vector<128x8xbf16>
      %c0_12 = arith.constant 0 : index
      %c0_13 = arith.constant 0 : index
      %14 = vector.load %arg4[%c0_12, %c0_13] : memref<128x8xbf16, #tpu.memory_space<vmem>>, vector<128x8xbf16>
      tpu.vector_store %arg4[%c0_12, %c0_13], %13 {strides = array<i32>} : memref<128x8xbf16, #tpu.memory_space<vmem>>, vector<128x8xbf16>,
      %cst_14 = arith.constant dense<0.000000e+00> : vector<8xf32>
      %15 = vector.multi_reduction <add>, %12, %cst_14 [0] : vector<128x8xf32> to vector<8xf32>
      %16 = vector.shape_cast %15 : vector<8xf32> to vector<1x8xf32>
      %c0_15 = arith.constant 0 : index
      %c0_16 = arith.constant 0 : index
      %17 = vector.load %arg5[%c0_15, %c0_16] : memref<8x8xf32, #tpu.memory_space<vmem>>, vector<1x8xf32>
      tpu.vector_store %arg5[%c0_15, %c0_16], %16 {strides = array<i32>} : memref<8x8xf32, #tpu.memory_space<vmem>>, vector<1x8xf32>,
      %18 = arith.mulf %12, %12 : vector<128x8xf32>
      %cst_17 = arith.constant dense<0.000000e+00> : vector<8xf32>
      %19 = vector.multi_reduction <add>, %18, %cst_17 [0] : vector<128x8xf32> to vector<8xf32>
      %20 = vector.shape_cast %19 : vector<8xf32> to vector<1x8xf32>
      %c1 = arith.constant 1 : index
      %c0_18 = arith.constant 0 : index
      %21 = vector.load %arg5[%c1, %c0_18] : memref<8x8xf32, #tpu.memory_space<vmem>>, vector<1x8xf32>
      tpu.vector_store %arg5[%c1, %c0_18], %20 {strides = array<i32>} : memref<8x8xf32, #tpu.memory_space<vmem>>, vector<1x8xf32>,
    } else {
    }
    return
  }
  func.func @transform_0(%arg0: i32, %arg1: i32) -> (i32, i32) {
    %c0_i32 = arith.constant 0 : i32
    return %arg0, %arg1 : i32, i32
  }
  func.func @transform_1(%arg0: i32, %arg1: i32) -> (i32, i32) {
    %c0_i32 = arith.constant 0 : i32
    %c0_i32_0 = arith.constant 0 : i32
    return %arg1, %c0_i32 : i32, i32
  }
  func.func @transform_2(%arg0: i32, %arg1: i32) -> (i32, i32) {
    %c0_i32 = arith.constant 0 : i32
    %c0_i32_0 = arith.constant 0 : i32
    return %arg0, %c0_i32 : i32, i32
  }
  func.func @transform_3(%arg0: i32, %arg1: i32) -> (i32, i32) {
    %c0_i32 = arith.constant 0 : i32
    %c0_i32_0 = arith.constant 0 : i32
    return %arg0, %c0_i32 : i32, i32
  }
}

module attributes {stable_mosaic.version = 11 : i64} {
  func.func @_matmul_stats_kernel(%arg0: i32, %arg1: i32, %arg2: memref<128x4xbf16, #tpu.memory_space<vmem>>, %arg3: memref<4x8xbf16, #tpu.memory_space<vmem>>, %arg4: memref<128x8xbf16, #tpu.memory_space<vmem>>, %arg5: memref<8x8xf32, #tpu.memory_space<vmem>>, %arg6: memref<128x8xf32, #tpu.memory_space<vmem>>) attributes {dimension_semantics = [#tpu.dimension_semantics<parallel>, #tpu.dimension_semantics<arbitrary>], iteration_bounds = array<i64: 1, 1>, scalar_prefetch = 0 : i64, scratch_operands = 1 : i64, tpu.core_type = #tpu.core_type<tc>, window_params = [{transform_indices = @transform_0, window_bounds = array<i64: 128, 4>}, {transform_indices = @transform_1, window_bounds = array<i64: 4, 8>}, {transform_indices = @transform_2, window_bounds = array<i64: 128, 8>}, {transform_indices = @transform_3, window_bounds = array<i64: 8, 8>}]} {
    %c0_i32 = arith.constant 0 : i32
    %0 = arith.cmpi eq, %arg1, %c0_i32 : i32
    %1 = arith.extui %0 : i1 to i32
    %c0_i32_0 = arith.constant 0 : i32
    %2 = arith.cmpi ne, %1, %c0_i32_0 : i32
    scf.if %2 {
      %cst_10 = arith.constant 0.000000e+00 : f32
      %12 = vector.broadcast %cst_10 : f32 to vector<128x8xf32>
      %c0_11 = arith.constant 0 : index
      %c0_12 = arith.constant 0 : index
      %13 = vector.load %arg6[%c0_11, %c0_12] : memref<128x8xf32, #tpu.memory_space<vmem>>, vector<128x8xf32>
      tpu.vector_store %arg6[%c0_11, %c0_12], %12 {strides = array<i32>} : memref<128x8xf32, #tpu.memory_space<vmem>>, vector<128x8xf32>,
    } else {
    }
    %c0 = arith.constant 0 : index
    %c0_1 = arith.constant 0 : index
    %3 = vector.load %arg6[%c0, %c0_1] : memref<128x8xf32, #tpu.memory_space<vmem>>, vector<128x8xf32>
    %c0_2 = arith.constant 0 : index
    %c0_3 = arith.constant 0 : index
    %4 = vector.load %arg2[%c0_2, %c0_3] : memref<128x4xbf16, #tpu.memory_space<vmem>>, vector<128x4xbf16>
    %c0_4 = arith.constant 0 : index
    %c0_5 = arith.constant 0 : index
    %5 = vector.load %arg3[%c0_4, %c0_5] : memref<4x8xbf16, #tpu.memory_space<vmem>>, vector<4x8xbf16>
    %cst = arith.constant dense<0.000000e+00> : vector<128x8xf32>
    %6 = tpu.matmul %4, %5, %cst {dimension_numbers = #tpu.dot_dimension_numbers<[1], [0], [0], [1], [0, 0, 1, 1], [], []>} : vector<128x4xbf16>, vector<4x8xbf16>, vector<128x8xf32> -> vector<128x8xf32>
    %7 = arith.addf %3, %6 : vector<128x8xf32>
    %c0_6 = arith.constant 0 : index
    %c0_7 = arith.constant 0 : index
    %8 = vector.load %arg6[%c0_6, %c0_7] : memref<128x8xf32, #tpu.memory_space<vmem>>, vector<128x8xf32>
    tpu.vector_store %arg6[%c0_6, %c0_7], %7 {strides = array<i32>} : memref<128x8xf32, #tpu.memory_space<vmem>>, vector<128x8xf32>,
    %c0_i32_8 = arith.constant 0 : i32
    %9 = arith.cmpi eq, %arg1, %c0_i32_8 : i32
    %10 = arith.extui %9 : i1 to i32
    %c0_i32_9 = arith.constant 0 : i32
    %11 = arith.cmpi ne, %10, %c0_i32_9 : i32
    scf.if %11 {
      %c0_10 = arith.constant 0 : index
      %c0_11 = arith.constant 0 : index
      %12 = vector.load %arg6[%c0_10, %c0_11] : memref<128x8xf32, #tpu.memory_space<vmem>>, vector<128x8xf32>
      %13 = arith.truncf %12 : vector<128x8xf32> to vector<128x8xbf16>
      %c0_12 = arith.constant 0 : index
      %c0_13 = arith.constant 0 : index
      %14 = vector.load %arg4[%c0_12, %c0_13] : memref<128x8xbf16, #tpu.memory_space<vmem>>, vector<128x8xbf16>
      tpu.vector_store %arg4[%c0_12, %c0_13], %13 {strides = array<i32>} : memref<128x8xbf16, #tpu.memory_space<vmem>>, vector<128x8xbf16>,
      %cst_14 = arith.constant dense<0.000000e+00> : vector<8xf32>
      %15 = vector.multi_reduction <add>, %12, %cst_14 [0] : vector<128x8xf32> to vector<8xf32>
      %16 = vector.shape_cast %15 : vector<8xf32> to vector<1x8xf32>
      %c0_15 = arith.constant 0 : index
      %c0_16 = arith.constant 0 : index
      %17 = vector.load %arg5[%c0_15, %c0_16] : memref<8x8xf32, #tpu.memory_space<vmem>>, vector<1x8xf32>
      tpu.vector_store %arg5[%c0_15, %c0_16], %16 {strides = array<i32>} : memref<8x8xf32, #tpu.memory_space<vmem>>, vector<1x8xf32>,
      %18 = arith.mulf %12, %12 : vector<128x8xf32>
      %cst_17 = arith.constant dense<0.000000e+00> : vector<8xf32>
      %19 = vector.multi_reduction <add>, %18, %cst_17 [0] : vector<128x8xf32> to vector<8xf32>
      %20 = vector.shape_cast %19 : vector<8xf32> to vector<1x8xf32>
      %c1 = arith.constant 1 : index
      %c0_18 = arith.constant 0 : index
      %21 = vector.load %arg5[%c1, %c0_18] : memref<8x8xf32, #tpu.memory_space<vmem>>, vector<1x8xf32>
      tpu.vector_store %arg5[%c1, %c0_18], %20 {strides = array<i32>} : memref<8x8xf32, #tpu.memory_space<vmem>>, vector<1x8xf32>,
    } else {
    }
    return
  }
  func.func @transform_0(%arg0: i32, %arg1: i32) -> (i32, i32) {
    %c0_i32 = arith.constant 0 : i32
    return %arg0, %arg1 : i32, i32
  }
  func.func @transform_1(%arg0: i32, %arg1: i32) -> (i32, i32) {
    %c0_i32 = arith.constant 0 : i32
    %c0_i32_0 = arith.constant 0 : i32
    return %arg1, %c0_i32 : i32, i32
  }
  func.func @transform_2(%arg0: i32, %arg1: i32) -> (i32, i32) {
    %c0_i32 = arith.constant 0 : i32
    %c0_i32_0 = arith.constant 0 : i32
    return %arg0, %c0_i32 : i32, i32
  }
  func.func @transform_3(%arg0: i32, %arg1: i32) -> (i32, i32) {
    %c0_i32 = arith.constant 0 : i32
    %c0_i32_0 = arith.constant 0 : i32
    return %arg0, %c0_i32 : i32, i32
  }
}

module attributes {stable_mosaic.version = 11 : i64} {
  func.func @_double_bn_add_relu_kernel(%arg0: i32, %arg1: memref<2x512xbf16, #tpu.memory_space<vmem>>, %arg2: memref<1x512xf32, #tpu.memory_space<vmem>>, %arg3: memref<1x512xf32, #tpu.memory_space<vmem>>, %arg4: memref<2x512xbf16, #tpu.memory_space<vmem>>, %arg5: memref<1x512xf32, #tpu.memory_space<vmem>>, %arg6: memref<1x512xf32, #tpu.memory_space<vmem>>, %arg7: memref<2x512xf32, #tpu.memory_space<vmem>>) attributes {dimension_semantics = [#tpu.dimension_semantics<parallel>], iteration_bounds = array<i64: 1>, scalar_prefetch = 0 : i64, scratch_operands = 0 : i64, tpu.core_type = #tpu.core_type<tc>, window_params = [{transform_indices = @transform_0, window_bounds = array<i64: 2, 512>}, {pipeline_mode = #tpu.pipeline_mode<synchronous>, transform_indices = @transform_1, window_bounds = array<i64: 1, 512>}, {pipeline_mode = #tpu.pipeline_mode<synchronous>, transform_indices = @transform_2, window_bounds = array<i64: 1, 512>}, {transform_indices = @transform_3, window_bounds = array<i64: 2, 512>}, {pipeline_mode = #tpu.pipeline_mode<synchronous>, transform_indices = @transform_4, window_bounds = array<i64: 1, 512>}, {pipeline_mode = #tpu.pipeline_mode<synchronous>, transform_indices = @transform_5, window_bounds = array<i64: 1, 512>}, {transform_indices = @transform_6, window_bounds = array<i64: 2, 512>}]} {
    %c0 = arith.constant 0 : index
    %c0_0 = arith.constant 0 : index
    %0 = vector.load %arg1[%c0, %c0_0] : memref<2x512xbf16, #tpu.memory_space<vmem>>, vector<2x512xbf16>
    %1 = arith.extf %0 : vector<2x512xbf16> to vector<2x512xf32>
    %c0_1 = arith.constant 0 : index
    %c0_2 = arith.constant 0 : index
    %2 = vector.load %arg4[%c0_1, %c0_2] : memref<2x512xbf16, #tpu.memory_space<vmem>>, vector<2x512xbf16>
    %3 = arith.extf %2 : vector<2x512xbf16> to vector<2x512xf32>
    %c0_3 = arith.constant 0 : index
    %c0_4 = arith.constant 0 : index
    %4 = vector.load %arg2[%c0_3, %c0_4] : memref<1x512xf32, #tpu.memory_space<vmem>>, vector<1x512xf32>
    %5 = vector.broadcast %4 : vector<1x512xf32> to vector<2x512xf32>
    %6 = arith.mulf %1, %5 : vector<2x512xf32>
    %c0_5 = arith.constant 0 : index
    %c0_6 = arith.constant 0 : index
    %7 = vector.load %arg3[%c0_5, %c0_6] : memref<1x512xf32, #tpu.memory_space<vmem>>, vector<1x512xf32>
    %8 = vector.broadcast %7 : vector<1x512xf32> to vector<2x512xf32>
    %9 = arith.addf %6, %8 : vector<2x512xf32>
    %c0_7 = arith.constant 0 : index
    %c0_8 = arith.constant 0 : index
    %10 = vector.load %arg5[%c0_7, %c0_8] : memref<1x512xf32, #tpu.memory_space<vmem>>, vector<1x512xf32>
    %11 = vector.broadcast %10 : vector<1x512xf32> to vector<2x512xf32>
    %12 = arith.mulf %3, %11 : vector<2x512xf32>
    %13 = arith.addf %9, %12 : vector<2x512xf32>
    %c0_9 = arith.constant 0 : index
    %c0_10 = arith.constant 0 : index
    %14 = vector.load %arg6[%c0_9, %c0_10] : memref<1x512xf32, #tpu.memory_space<vmem>>, vector<1x512xf32>
    %15 = vector.broadcast %14 : vector<1x512xf32> to vector<2x512xf32>
    %16 = arith.addf %13, %15 : vector<2x512xf32>
    %cst = arith.constant 0.000000e+00 : f32
    %17 = vector.broadcast %cst : f32 to vector<2x512xf32>
    %18 = arith.maximumf %16, %17 : vector<2x512xf32>
    %c0_11 = arith.constant 0 : index
    %c0_12 = arith.constant 0 : index
    %19 = vector.load %arg7[%c0_11, %c0_12] : memref<2x512xf32, #tpu.memory_space<vmem>>, vector<2x512xf32>
    tpu.vector_store %arg7[%c0_11, %c0_12], %18 {strides = array<i32>} : memref<2x512xf32, #tpu.memory_space<vmem>>, vector<2x512xf32>,
    return
  }
  func.func @transform_0(%arg0: i32) -> (i32, i32) {
    %c0_i32 = arith.constant 0 : i32
    %c0_i32_0 = arith.constant 0 : i32
    return %arg0, %c0_i32 : i32, i32
  }
  func.func @transform_1(%arg0: i32) -> (i32, i32) {
    %c0_i32 = arith.constant 0 : i32
    %c0_i32_0 = arith.constant 0 : i32
    %c0_i32_1 = arith.constant 0 : i32
    return %c0_i32, %c0_i32_0 : i32, i32
  }
  func.func @transform_2(%arg0: i32) -> (i32, i32) {
    %c0_i32 = arith.constant 0 : i32
    %c0_i32_0 = arith.constant 0 : i32
    %c0_i32_1 = arith.constant 0 : i32
    return %c0_i32, %c0_i32_0 : i32, i32
  }
  func.func @transform_3(%arg0: i32) -> (i32, i32) {
    %c0_i32 = arith.constant 0 : i32
    %c0_i32_0 = arith.constant 0 : i32
    return %arg0, %c0_i32 : i32, i32
  }
  func.func @transform_4(%arg0: i32) -> (i32, i32) {
    %c0_i32 = arith.constant 0 : i32
    %c0_i32_0 = arith.constant 0 : i32
    %c0_i32_1 = arith.constant 0 : i32
    return %c0_i32, %c0_i32_0 : i32, i32
  }
  func.func @transform_5(%arg0: i32) -> (i32, i32) {
    %c0_i32 = arith.constant 0 : i32
    %c0_i32_0 = arith.constant 0 : i32
    %c0_i32_1 = arith.constant 0 : i32
    return %c0_i32, %c0_i32_0 : i32, i32
  }
  func.func @transform_6(%arg0: i32) -> (i32, i32) {
    %c0_i32 = arith.constant 0 : i32
    %c0_i32_0 = arith.constant 0 : i32
    return %arg0, %c0_i32 : i32, i32
  }
}

</mosaic_0001>

<bundles_post_ra>
// kernel: tile.33
= control target key start
LH: loop header
LB: loop body
LE: loop exit
PB: predicated region body
PF: predicated region fallthrough
CT: control target
= control target key end

     0   :  { %s64_s0 = inlined_call_operand.vmem [shape: f32[8], index: 0, kind: input, shape index: {}]   ;;  %s65_s1 = inlined_call_operand.vmem [shape: f32[64,8], index: 1, kind: output, shape index: {}]  }
   0x1   :  { %v4_v0 = vld [vmem:[%s64_s0] ss:$0 sm:$0xff] }
   0x2   :  { %5 = vst [vmem:[%s65_s1] sm:$0xff] %v4_v0  ;;  %20 = vst [vmem:[%s65_s1 + $0x8] sm:$0xff] %v4_v0 }
   0x3   :  { %21 = vst [vmem:[%s65_s1 + $0x10] sm:$0xff] %v4_v0  ;;  %22 = vst [vmem:[%s65_s1 + $0x18] sm:$0xff] %v4_v0 }
   0x4   :  { %23 = vst [vmem:[%s65_s1 + $0x20] sm:$0xff] %v4_v0  ;;  %24 = vst [vmem:[%s65_s1 + $0x28] sm:$0xff] %v4_v0 }
   0x5   :  { %25 = vst [vmem:[%s65_s1 + $0x30] sm:$0xff] %v4_v0  ;;  %26 = vst [vmem:[%s65_s1 + $0x38] sm:$0xff] %v4_v0 }

// kernel: tile.34
= control target key start
LH: loop header
LB: loop body
LE: loop exit
PB: predicated region body
PF: predicated region fallthrough
CT: control target
= control target key end

     0   :  { %vm6_vm0 = vcmask 1043458   ;;  %s11_s6 = smov 3  ;;  %s14_s7 = smov 12  ;;  %vm8_vm1 = vcmask 64512   ;;  %vm20_vm2 = vcmask 1048512   ;;  %vm32_vm3 = vcmask 982912   ;;  %s412_s0 = inlined_call_operand.vmem [shape: f32[64,8], index: 0, kind: input, shape index: {}]   ;;  %s413_s1 = inlined_call_operand.vmem [shape: f32[1,512], index: 1, kind: output, shape index: {}]  }
   0x1   :  { %v215_v0 = vld [vmem:[%s412_s0 + $0xf] ss:$16 sm:%s11_s6]   ;;  %s35_s12 = smov 3  ;;  %s38_s15 = smov 12  ;;  %vm44_vm4 = vcmask 917312   ;;  %vm56_vm5 = vcmask 851712  }
   0x2   :  { %v216_v1 = vld [vmem:[%s412_s0 + $0xf] ss:$16 sm:%s14_s7]   ;;  %v219_v3 = vld [vmem:[%s412_s0 + $0xd] ss:$16 sm:%s35_s12]   ;;  %s263_s16 = smov 120   ;;  %s23_s19 = smov 3 }
   0x3   :  { %v17_v2 = vsel %vm6_vm0, %v216_v1, %v215_v0  ;;  %v220_v4 = vld [vmem:[%s412_s0 + $0xd] ss:$16 sm:%s38_s15]   ;;  %s26_s20 = smov 12  ;;  %v217_v6 = vld [vmem:[%s412_s0 + $0xe] ss:$16 sm:%s23_s19]   ;;  %s47_s25 = smov 3 }
   0x4   :  { %18 = vrot.lane.b32.xlu0 %v17_v2, %s263_s16  ;;  %v41_v5 = vsel %vm6_vm0, %v220_v4, %v219_v3  ;;  %v218_v7 = vld [vmem:[%s412_s0 + $0xe] ss:$16 sm:%s26_s20]   ;;  %s264_s26 = smov 104   ;;  %s50_s29 = smov 12  ;;  %vm68_vm6 = vcmask 786112   ;;  %vm80_vm7 = vcmask 720512  }
   0x5   :  { %42 = vrot.lane.b32.xlu1 %v41_v5, %s264_s26  ;;  %v29_v8 = vsel %vm6_vm0, %v218_v7, %v217_v6  ;;  %v221_v9 = vld [vmem:[%s412_s0 + $0xc] ss:$16 sm:%s47_s25]   ;;  %s59_s3 = smov 3  ;;  %s62_s4 = smov 12  ;;  %vm92_vm8 = vcmask 654912   ;;  %vm104_vm9 = vcmask 589312  }
   0x6   :  { %v222_v10 = vld [vmem:[%s412_s0 + $0xc] ss:$16 sm:%s50_s29]   ;;  %s265_s5 = smov 112   ;;  %v223_v12 = vld [vmem:[%s412_s0 + $0xb] ss:$16 sm:%s59_s3]   ;;  %s71_s8 = smov 3 }
   0x7   :  { %v53_v11 = vsel %vm6_vm0, %v222_v10, %v221_v9  ;;  %v224_v13 = vld [vmem:[%s412_s0 + $0xb] ss:$16 sm:%s62_s4]   ;;  %v225_v14 = vld [vmem:[%s412_s0 + $0xa] ss:$16 sm:%s71_s8]   ;;  %s74_s13 = smov 12  ;;  %s266_s14 = smov 96  }
   0x8   :  { %30 = vrot.lane.b32.xlu0 %v29_v8, %s265_s5  ;;  %v65_v15 = vsel %vm6_vm0, %v224_v13, %v223_v12  ;;  %v226_v16 = vld [vmem:[%s412_s0 + $0xa] ss:$16 sm:%s74_s13]   ;;  %s83_s17 = smov 3  ;;  %s86_s18 = smov 12  ;;  %vm116_vm10 = vcmask 523712   ;;  %vm128_vm11 = vcmask 458112  }
   0x9   :  { %54 = vrot.lane.b32.xlu1 %v53_v11, %s266_s14  ;;  %v77_v17 = vsel %vm6_vm0, %v226_v16, %v225_v14  ;;  %v227_v18 = vld [vmem:[%s412_s0 + $0x9] ss:$16 sm:%s83_s17]   ;;  %s95_s23 = smov 3  ;;  %s267_s24 = smov 88   ;;  %vm140_vm12 = vcmask 392512   ;;  %vm152_vm13 = vcmask 326912  }
   0xa   :  { %v228_v19 = vld [vmem:[%s412_s0 + $0x9] ss:$16 sm:%s86_s18]   ;;  %v229_v20 = vld [vmem:[%s412_s0 + $0x8] ss:$16 sm:%s95_s23]   ;;  %s98_s27 = smov 12  ;;  %s107_s30 = smov 3 }
   0xb   :  { %v89_v21 = vsel %vm6_vm0, %v228_v19, %v227_v18  ;;  %v230_v22 = vld [vmem:[%s412_s0 + $0x8] ss:$16 sm:%s98_s27]   ;;  %s110_s2 = smov 12  ;;  %s268_s3 = smov 80   ;;  %v231_v23 = vld [vmem:[%s412_s0 + $0x7] ss:$16 sm:%s107_s30]  }
   0xc   :  { %66 = vrot.lane.b32.xlu0 %v65_v15, %s267_s24  ;;  %s119_s6 = smov 3  ;;  %v101_v24 = vsel %vm6_vm0, %v230_v22, %v229_v20  ;;  %v232_v25 = vld [vmem:[%s412_s0 + $0x7] ss:$16 sm:%s110_s2]   ;;  %s122_s11 = smov 12  ;;  %vm164_vm14 = vcmask 261312   ;;  %vm176_vm15 = vcmask 195712  }
   0xd   :  { %78 = vrot.lane.b32.xlu1 %v77_v17, %s268_s3  ;;  %v233_v26 = vld [vmem:[%s412_s0 + $0x6] ss:$16 sm:%s119_s6]   ;;  %s269_s12 = smov 72   ;;  %s131_s15 = smov 3  ;;  %v113_v28 = vsel %vm6_vm0, %v232_v25, %v231_v23 }
   0xe   :  { %v234_v27 = vld [vmem:[%s412_s0 + $0x6] ss:$16 sm:%s122_s11]   ;;  %s134_s16 = smov 12  ;;  %v235_v29 = vld [vmem:[%s412_s0 + $0x5] ss:$16 sm:%s131_s15]   ;;  %s143_s19 = smov 3 }
   0xf   :  { %s270_s20 = smov 64   ;;  %v236_v30 = vld [vmem:[%s412_s0 + $0x5] ss:$16 sm:%s134_s16]   ;;  %s146_s23 = smov 12  ;;  %v125_v31 = vsel %vm6_vm0, %v234_v27, %v233_v26  ;;  %v237_v32 = vld [vmem:[%s412_s0 + $0x4] ss:$16 sm:%s143_s19]  }
  0x10   :  { %90 = vrot.lane.b32.xlu0 %v89_v21, %s269_s12  ;;  %s155_s26 = smov 3  ;;  %s158_s27 = smov 12  ;;  %v238_v33 = vld [vmem:[%s412_s0 + $0x4] ss:$16 sm:%s146_s23]   ;;  %v137_v34 = vsel %vm6_vm0, %v236_v30, %v235_v29 }
  0x11   :  { %102 = vrot.lane.b32.xlu1 %v101_v24, %s270_s20  ;;  %s271_s28 = smov 56   ;;  %s167_s2 = smov 3  ;;  %v239_v35 = vld [vmem:[%s412_s0 + $0x3] ss:$16 sm:%s155_s26]   ;;  %v149_v37 = vsel %vm6_vm0, %v238_v33, %v237_v32 }
  0x12   :  { %s170_s5 = smov 12  ;;  %s272_s6 = smov 48   ;;  %v240_v36 = vld [vmem:[%s412_s0 + $0x3] ss:$16 sm:%s158_s27]   ;;  %v241_v38 = vld [vmem:[%s412_s0 + $0x2] ss:$16 sm:%s167_s2]  }
  0x13   :  { %s179_s9 = smov 3  ;;  %v242_v39 = vld [vmem:[%s412_s0 + $0x2] ss:$16 sm:%s170_s5]   ;;  %s182_s14 = smov 12  ;;  %v161_v41 = vsel %vm6_vm0, %v240_v36, %v239_v35 }
  0x14   :  { %114 = vrot.lane.b32.xlu0 %v113_v28, %s271_s28  ;;  %s2_s15 = smov 3  ;;  %s273_s16 = smov 40   ;;  %v243_v42 = vld [vmem:[%s412_s0 + $0x1] ss:$16 sm:%s179_s9]   ;;  %v173_v46 = vsel %vm6_vm0, %v242_v39, %v241_v38 }
  0x15   :  { %126 = vrot.lane.b32.xlu1 %v125_v31, %s272_s6  ;;  %v3_v40 = vld [vmem:[%s412_s0] ss:$16 sm:%s2_s15]   ;;  %s4_s19 = smov 12  ;;  %s274_s24 = smov 32  }
  0x16   :  { %v5_v43 = vld [vmem:[%s412_s0] ss:$16 sm:%s4_s19]   ;;  %v244_v44 = vld [vmem:[%s412_s0 + $0x1] ss:$16 sm:%s182_s14]   ;;  %s275_s0 = smov 24   ;;  %s276_s27 = smov 16  }
  0x17   :  { %v7_v45 = vsel %vm6_vm0, %v5_v43, %v3_v40  ;;  %v185_v47 = vsel %vm6_vm0, %v244_v44, %v243_v42  ;;  %s277_s28 = smov 8   ;;  %vm188_vm0 = vcmask 130112  }
  0x18   :  { %138 = vrot.lane.b32.xlu0 %v137_v34, %s273_s16  ;;  %9 = vst.msk [vmem:[#allocation0] ss:$8 sm:$0xf] %vm8_vm1, %v7_v45  }
  0x19   :  { %150 = vrot.lane.b32.xlu1 %v149_v37, %s274_s24 }
  0x1c   :  { %162 = vrot.lane.b32.xlu0 %v161_v41, %s275_s0 }
  0x1d   :  { %174 = vrot.lane.b32.xlu1 %v173_v46, %s276_s27 }
  0x20   :  { %186 = vrot.lane.b32.xlu0 %v185_v47, %s277_s28 }
  0x76   :  { %v19_v48 = vpop.permute.xlu0 %18  }
  0x77   :  { %21 = vst.msk [vmem:[#allocation0] ss:$8 sm:$0xf] %vm20_vm2, %v19_v48   ;;  %v43_v49 = vpop.permute.xlu1 %42  }
  0x7a   :  { %v31_v50 = vpop.permute.xlu0 %30  }
  0x7b   :  { %33 = vst.msk [vmem:[#allocation0] ss:$8 sm:$0xf] %vm32_vm3, %v31_v50   ;;  %v55_v51 = vpop.permute.xlu1 %54  }
  0x7c   :  { %45 = vst.msk [vmem:[#allocation0] ss:$8 sm:$0xf] %vm44_vm4, %v43_v49  }
  0x7d   :  { %57 = vst.msk [vmem:[#allocation0] ss:$8 sm:$0xf] %vm56_vm5, %v55_v51  }
  0x7e   :  { %v67_v52 = vpop.permute.xlu0 %66  }
  0x7f   :  { %69 = vst.msk [vmem:[#allocation0] ss:$8 sm:$0xf] %vm68_vm6, %v67_v52   ;;  %v79_v53 = vpop.permute.xlu1 %78  }
  0x80   :  { %81 = vst.msk [vmem:[#allocation0] ss:$8 sm:$0xf] %vm80_vm7, %v79_v53  }
  0x82   :  { %v91_v54 = vpop.permute.xlu0 %90  }
  0x83   :  { %93 = vst.msk [vmem:[#allocation0] ss:$8 sm:$0xf] %vm92_vm8, %v91_v54   ;;  %v103_v55 = vpop.permute.xlu1 %102  }
  0x84   :  { %105 = vst.msk [vmem:[#allocation0] ss:$8 sm:$0xf] %vm104_vm9, %v103_v55  }
  0x86   :  { %v115_v56 = vpop.permute.xlu0 %114  }
  0x87   :  { %117 = vst.msk [vmem:[#allocation0] ss:$8 sm:$0xf] %vm116_vm10, %v115_v56   ;;  %v127_v57 = vpop.permute.xlu1 %126  }
  0x88   :  { %129 = vst.msk [vmem:[#allocation0] ss:$8 sm:$0xf] %vm128_vm11, %v127_v57  }
  0x8a   :  { %v139_v58 = vpop.permute.xlu0 %138  }
  0x8b   :  { %141 = vst.msk [vmem:[#allocation0] ss:$8 sm:$0xf] %vm140_vm12, %v139_v58   ;;  %v151_v59 = vpop.permute.xlu1 %150  }
  0x8c   :  { %153 = vst.msk [vmem:[#allocation0] ss:$8 sm:$0xf] %vm152_vm13, %v151_v59  }
  0x8e   :  { %v163_v60 = vpop.permute.xlu0 %162  }
  0x8f   :  { %165 = vst.msk [vmem:[#allocation0] ss:$8 sm:$0xf] %vm164_vm14, %v163_v60   ;;  %v175_v61 = vpop.permute.xlu1 %174  }
  0x90   :  { %177 = vst.msk [vmem:[#allocation0] ss:$8 sm:$0xf] %vm176_vm15, %v175_v61  }
  0x92   :  { %v187_v62 = vpop.permute.xlu0 %186  }
  0x93   :  { %189 = vst.msk [vmem:[#allocation0] ss:$8 sm:$0xf] %vm188_vm0, %v187_v62  }
  0x9a   :  { %v193_v63 = vld [vmem:[#allocation0] sm:$0x1]  ;;  %v197_v0 = vld [vmem:[#allocation0 + $0x8] sm:$0x1]  ;;  %v202_v1 = vld [vmem:[#allocation0 + $0x10] sm:$0x1] }
  0x9b   :  { %195 = vst [vmem:[%s413_s1] sm:$0x1] %v193_v63  ;;  %245 = vst [vmem:[%s413_s1 + $0x1] sm:$0x1] %v197_v0  ;;  %v208_v2 = vld [vmem:[#allocation0 + $0x18] sm:$0x1] }
  0x9c   :  { %246 = vst [vmem:[%s413_s1 + $0x2] sm:$0x1] %v202_v1  ;;  %247 = vst [vmem:[%s413_s1 + $0x3] sm:$0x1] %v208_v2 }

// kernel: basic_block_forward.6
= control target key start
LH: loop header
LB: loop body
LE: loop exit
PB: predicated region body
PF: predicated region fallthrough
CT: control target
= control target key end

     0   :  { %v18_v0 = vlaneseq  ;;  %v156_v1 = vmov 1983009808   ;;  %v157_v33 = vmov 1966171168   ;;  %s190_s1 = inlined_call_operand.vmem [shape: f32[1,512], index: 1, kind: input, shape index: {}]   ;;  %s191_s2 = inlined_call_operand.vmem [shape: f32[1,512], index: 2, kind: input, shape index: {}]   ;;  %s192_s0 = inlined_call_operand.vmem [shape: bf16[2,512], index: 0, kind: input, shape index: {}]   ;;  %s193_s3 = inlined_call_operand.vmem [shape: bf16[2,512], index: 3, kind: output, shape index: {}]  }
   0x1   :  { %v37_v2 = vunpack.c.l.s4 %v156_v1  ;;  %v16_v4 = vld [vmem:[%s190_s1] sm:$0xf]  ;;  %v124_v34 = vunpack.c.l.s4 %v157_v33 }
   0x2   :  { %v19_v3 = vshrl.u32 %v18_v0, 7  ;;  %v53_v10 = vld [vmem:[%s191_s2] sm:$0xf] }
   0x3   :  { %v38_v5 = vunpack.c.0.s8 %v37_v2  ;;  %v14_v16 = vld [vmem:[%s192_s0] sm:$0xf]  ;;  %v125_v37 = vunpack.c.0.s8 %v124_v34 }
   0x4   :  { %v20_v6 = vsub.s32 0, %v19_v3  ;;  %v24_v7 = vsub.s32 1, %v19_v3  ;;  %v28_v8 = vsub.s32 2, %v19_v3  ;;  %v32_v9 = vsub.s32 3, %v19_v3 }
   0x5   :  { %v41_v11 = vsub.s32 %v38_v5, %v19_v3  ;;  %v15_v25 = vunpack.c.l.bf16 %v14_v16  ;;  %v128_v42 = vsub.s32 %v125_v37, %v19_v3 }
   0x6   :  { %v21_v12 = vrot.slane %v16_v4, %v20_v6  ;;  %v25_v13 = vrot.slane %v16_v4, %v24_v7  ;;  %v29_v14 = vrot.slane %v16_v4, %v28_v8  ;;  %v33_v15 = vrot.slane %v16_v4, %v32_v9 }
   0x7   :  { %v58_v17 = vrot.slane %v53_v10, %v20_v6  ;;  %v62_v18 = vrot.slane %v53_v10, %v24_v7  ;;  %v66_v19 = vrot.slane %v53_v10, %v28_v8  ;;  %v70_v20 = vrot.slane %v53_v10, %v32_v9 }
   0x8   :  { %v34_v21 = vcombine.low %v21_v12, %v25_v13  ;;  %v35_v22 = vcombine.low %v29_v14, %v33_v15 }
   0x9   :  { %v71_v23 = vcombine.low %v58_v17, %v62_v18  ;;  %v72_v24 = vcombine.low %v66_v19, %v70_v20 }
   0xa   :  { %v42_v26 = vrot.slane %v34_v21, %v41_v11  ;;  %v49_v27 = vrot.slane %v35_v22, %v41_v11 }
   0xb   :  { %v79_v28 = vrot.slane %v71_v23, %v41_v11  ;;  %v86_v29 = vrot.slane %v72_v24, %v41_v11 }
   0xc   :  { %v50_v30 = vcombine.low %v42_v26, %v49_v27 }
   0xd   :  { %v87_v31 = vcombine.low %v79_v28, %v86_v29 }
   0xe   :  { %v52_v32 = vmul.f32 %v50_v30, %v15_v25 }
  0x10   :  { %v89_v35 = vadd.f32 %v87_v31, %v52_v32 }
  0x12   :  { %v90_v36 = vmax.f32 %v89_v35, 0.0 }
  0x14   :  { %v92_v38 = vcombine.high %v90_v36, %v90_v36  ;;  %v99_v39 = vrot.slane %v90_v36, %v41_v11 }
  0x16   :  { %v106_v40 = vrot.slane %v92_v38, %v41_v11  ;;  %v107_v41 = vcombine.high %v99_v39, %v99_v39 }
  0x18   :  { %v108_v43 = vcombine.high %v106_v40, %v106_v40  ;;  %v151_v44 = vpack.c.bf16 %v107_v41, %v99_v39 }
  0x1a   :  { %v152_v45 = vpack.c.bf16 %v108_v43, %v106_v40  ;;  %v129_v46 = vrot.slane %v151_v44, %v128_v42 }
  0x1c   :  { %v136_v47 = vrot.slane %v152_v45, %v128_v42 }
  0x1e   :  { %v137_v48 = vcombine.low %v129_v46, %v136_v47 }
  0x20   :  { %153 = vst.sshfl [vmem:[%s193_s3] sm:$0x55 pattern:$0x73625140] %v137_v48 }

// kernel: basic_block_forward.5
= control target key start
LH: loop header
LB: loop body
LE: loop exit
PB: predicated region body
PF: predicated region fallthrough
CT: control target
= control target key end

     0   :  { %vm18_vm0 = vcmask 64512   ;;  %v591_v1 = vmov 0.0   ;;  %vm127_vm1 = vcmask 293888   ;;  %vm152_vm2 = vcmask 1041408   ;;  %s828_s1 = inlined_call_operand.vmem [shape: bf16[36,8], index: 1, kind: input, shape index: {}]   ;;  %s829_s0 = inlined_call_operand.vmem [shape: bf16[128,36], index: 0, kind: input, shape index: {}]   ;;  %s830_s2 = inlined_call_operand.vmem [shape: bf16[128,8], index: 2, kind: output, shape index: {0}]   ;;  %s831_s3 = inlined_call_operand.vmem [shape: f32[8,8], index: 3, kind: output, shape index: {1}]  }
   0x1   :  { %v580_v0 = vld [vmem:[%s828_s1] sm:$0xff]   ;;  %21 = vst.msk [vmem:[#allocation2 + $0x10] sm:$0xff] %vm18_vm0, %v591_v1  ;;  %19 = vst.msk [vmem:[#allocation2] sm:$0xff] %vm18_vm0, %v591_v1  ;;  %v581_v2 = vld [vmem:[%s828_s1 + $0x8] sm:$0xff]   ;;  %vm369_vm3 = vcmask 60416   ;;  %vm423_vm4 = vcmask 57344  }
   0x2   :  { %20 = vst.msk [vmem:[#allocation2 + $0x8] sm:$0xff] %vm18_vm0, %v591_v1  ;;  %22 = vst.msk [vmem:[#allocation2 + $0x18] sm:$0xff] %vm18_vm0, %v591_v1  ;;  %549 = vmatprep.subr.bf16.mxu0 %v580_v0  ;;  %v582_v3 = vld [vmem:[%s828_s1 + $0x10] ss:$0 sps:$4 sm:$0x33]   ;;  %v583_v4 = vld [vmem:[%s829_s0] sm:$0xff]   ;;  %571 = vmatprep.subr.bf16.mxu1 %v580_v0 }
   0x3   :  { %23 = vst.msk [vmem:[#allocation2 + $0x20] sm:$0xff] %vm18_vm0, %v591_v1  ;;  %24 = vst.msk [vmem:[#allocation2 + $0x28] sm:$0xff] %vm18_vm0, %v591_v1  ;;  %550 = vmatpush3.bf16.msra.mxu0 %v580_v0  ;;  %574 = vmatpush3.bf16.msra.mxu1 %v580_v0  ;;  %v587_v5 = vld [vmem:[%s829_s0 + $0x20] sm:$0xff]   ;;  %v154_v6 = vsel %vm152_vm2, %v582_v3, 0  ;;  %v584_v7 = vld [vmem:[%s829_s0 + $0x8] sm:$0xff]  }
   0x4   :  { %25 = vst.msk [vmem:[#allocation2 + $0x30] sm:$0xff] %vm18_vm0, %v591_v1  ;;  %26 = vst.msk [vmem:[#allocation2 + $0x38] sm:$0xff] %vm18_vm0, %v591_v1  ;;  %551 = vmatprep.subr.bf16.mxu0 %v581_v2  ;;  %555 = vmatprep.mubr.msk.bf16.mxu0 %vm127_vm1, %v583_v4  ;;  %v588_v8 = vld [vmem:[%s829_s0 + $0x28] sm:$0xff]   ;;  %v585_v9 = vld [vmem:[%s829_s0 + $0x10] sm:$0xff]  }
   0x5   :  { %27 = vst.msk [vmem:[#allocation2 + $0x40] sm:$0xff] %vm18_vm0, %v591_v1  ;;  %28 = vst.msk [vmem:[#allocation2 + $0x48] sm:$0xff] %vm18_vm0, %v591_v1  ;;  %572 = vmatprep.subr.bf16.mxu1 %v581_v2  ;;  %563 = vmatprep.mubr.msk.bf16.mxu1 %vm127_vm1, %v587_v5  ;;  %v589_v10 = vld [vmem:[%s829_s0 + $0x30] sm:$0xff]   ;;  %v586_v11 = vld [vmem:[%s829_s0 + $0x18] sm:$0xff]  }
   0x6   :  { %29 = vst.msk [vmem:[#allocation2 + $0x50] sm:$0xff] %vm18_vm0, %v591_v1  ;;  %30 = vst.msk [vmem:[#allocation2 + $0x58] sm:$0xff] %vm18_vm0, %v591_v1  ;;  %v590_v12 = vld [vmem:[%s829_s0 + $0x38] sm:$0xff]  }
   0x7   :  { %31 = vst.msk [vmem:[#allocation2 + $0x60] sm:$0xff] %vm18_vm0, %v591_v1  ;;  %32 = vst.msk [vmem:[#allocation2 + $0x68] sm:$0xff] %vm18_vm0, %v591_v1  ;;  %552 = vmatpush3.bf16.msra.mxu0 %v581_v2  ;;  %575 = vmatpush3.bf16.msra.mxu1 %v581_v2 }
   0x8   :  { %33 = vst.msk [vmem:[#allocation2 + $0x70] sm:$0xff] %vm18_vm0, %v591_v1  ;;  %34 = vst.msk [vmem:[#allocation2 + $0x78] sm:$0xff] %vm18_vm0, %v591_v1  ;;  %577 = vmatprep.subr.msk.bf16.mxu0 %vm152_vm2, %v582_v3  ;;  %578 = vmatprep.subr.msk.bf16.mxu1 %vm152_vm2, %v582_v3  ;;  %v37_v13 = vld [vmem:[#allocation2 + $0x10] sm:$0xff]  ;;  %v35_v15 = vld [vmem:[#allocation2] sm:$0xff] }
   0x9   :  { %v38_v18 = vld [vmem:[#allocation2 + $0x18] sm:$0xff]  ;;  %v36_v23 = vld [vmem:[#allocation2 + $0x8] sm:$0xff] }
   0xa   :  { %v39_v39 = vld [vmem:[#allocation2 + $0x20] sm:$0xff]  ;;  %v40_v46 = vld [vmem:[#allocation2 + $0x28] sm:$0xff] }
   0xb   :  { %554 = vmatpush3.bf16.msra.mxu0 %v154_v6  ;;  %576 = vmatpush3.bf16.msra.mxu1 %v154_v6  ;;  %v41_v37 = vld [vmem:[#allocation2 + $0x30] sm:$0xff]  ;;  %v42_v42 = vld [vmem:[#allocation2 + $0x38] sm:$0xff] }
   0xc   :  { %v43_v16 = vld [vmem:[#allocation2 + $0x40] sm:$0xff]  ;;  %v44_v26 = vld [vmem:[#allocation2 + $0x48] sm:$0xff] }
   0xd   :  { %v45_v14 = vld [vmem:[#allocation2 + $0x50] sm:$0xff]  ;;  %v46_v20 = vld [vmem:[#allocation2 + $0x58] sm:$0xff] }
   0xe   :  { %556 = vmatmul.mubr.msk.bf16.vlgmr.msra.gmra.mrb[0].mxu0 %vm127_vm1, %v584_v7  ;;  %564 = vmatmul.mubr.msk.bf16.vlgmr.msra.gmra.mrb[0].mxu1 %vm127_vm1, %v588_v8  ;;  %v47_v40 = vld [vmem:[#allocation2 + $0x60] sm:$0xff] }
   0xf   :  { %559 = vmatprep.mubr.msk.bf16.mxu0 %vm127_vm1, %v585_v9  ;;  %567 = vmatprep.mubr.msk.bf16.mxu1 %vm127_vm1, %v589_v10  ;;  %v49_v38 = vld [vmem:[#allocation2 + $0x70] sm:$0xff] }
  0x16   :  { %560 = vmatmul.mubr.msk.bf16.gmra.mrb[4].mxu0 %vm127_vm1, %v586_v11  ;;  %568 = vmatmul.mubr.msk.bf16.gmra.mrb[4].mxu1 %vm127_vm1, %v590_v12 }
  0xe1   :  { %v557_v17 = vpop.f32.mrb[0].mxu0  ;;  %v565_v19 = vpop.f32.mrb[0].mxu1 }
  0xe2   :  { %v255_v21 = vadd.f32 %v557_v17, %v37_v13  ;;  %v190_v22 = vpop.f32.mrb[1].mxu0  ;;  %v263_v24 = vadd.f32 %v565_v19, %v45_v14  ;;  %v222_v25 = vpop.f32.mrb[1].mxu1 }
  0xe3   :  { %v253_v27 = vadd.f32 %v190_v22, %v35_v15  ;;  %v558_v28 = vpop.f32.mrb[2].mxu0  ;;  %v261_v29 = vadd.f32 %v222_v25, %v43_v16  ;;  %v566_v30 = vpop.f32.mrb[2].mxu1 }
  0xe4   :  { %272 = vst.msk [vmem:[#allocation2 + $0x10] sm:$0xff] %vm18_vm0, %v255_v21  ;;  %v256_v31 = vadd.f32 %v558_v28, %v38_v18  ;;  %v193_v32 = vpop.f32.mrb[3].mxu0  ;;  %280 = vst.msk [vmem:[#allocation2 + $0x50] sm:$0xff] %vm18_vm0, %v263_v24  ;;  %v264_v33 = vadd.f32 %v566_v30, %v46_v20  ;;  %v225_v34 = vpop.f32.mrb[3].mxu1 }
  0xe5   :  { %270 = vst.msk [vmem:[#allocation2] sm:$0xff] %vm18_vm0, %v253_v27  ;;  %v254_v35 = vadd.f32 %v193_v32, %v36_v23  ;;  %278 = vst.msk [vmem:[#allocation2 + $0x40] sm:$0xff] %vm18_vm0, %v261_v29  ;;  %v262_v36 = vadd.f32 %v225_v34, %v44_v26 }
  0xe6   :  { %273 = vst.msk [vmem:[#allocation2 + $0x18] sm:$0xff] %vm18_vm0, %v256_v31  ;;  %281 = vst.msk [vmem:[#allocation2 + $0x58] sm:$0xff] %vm18_vm0, %v264_v33 }
  0xe7   :  { %271 = vst.msk [vmem:[#allocation2 + $0x8] sm:$0xff] %vm18_vm0, %v254_v35  ;;  %279 = vst.msk [vmem:[#allocation2 + $0x48] sm:$0xff] %vm18_vm0, %v262_v36 }
  0xe9   :  { %v561_v41 = vpop.f32.mrb[4].mxu0  ;;  %v569_v43 = vpop.f32.mrb[4].mxu1 }
  0xea   :  { %v259_v44 = vadd.f32 %v561_v41, %v41_v37  ;;  %v206_v45 = vpop.f32.mrb[5].mxu0  ;;  %v267_v47 = vadd.f32 %v569_v43, %v49_v38  ;;  %v238_v48 = vpop.f32.mrb[5].mxu1 }
  0xeb   :  { %v291_v49 = vld [vmem:[#allocation2 + $0x10] sm:$0xff]  ;;  %v257_v50 = vadd.f32 %v206_v45, %v39_v39  ;;  %v562_v51 = vpop.f32.mrb[6].mxu0  ;;  %v265_v52 = vadd.f32 %v238_v48, %v47_v40  ;;  %v677_v53 = vpop.f32.mrb[6].mxu1 }
  0xec   :  { %v524_v54 = vpack.c.bf16 %v291_v49, %v291_v49  ;;  %v289_v55 = vld [vmem:[#allocation2] sm:$0xff]  ;;  %276 = vst.msk [vmem:[#allocation2 + $0x30] sm:$0xff] %vm18_vm0, %v259_v44  ;;  %v260_v56 = vadd.f32 %v562_v51, %v42_v42  ;;  %v209_v57 = vpop.f32.mrb[7].mxu0  ;;  %284 = vst.msk [vmem:[#allocation2 + $0x70] sm:$0xff] %vm18_vm0, %v267_v47  ;;  %v681_v58 = vpop.f32.mrb[7].mxu1  ;;  %v684_v63 = vld [vmem:[#allocation2 + $0x50] sm:$0xff]  ;;  %v427_v0 = vmul.f32 %v291_v49, %v291_v49 }
  0xed   :  { %v522_v59 = vpack.c.bf16 %v289_v55, %v289_v55  ;;  %v425_v60 = vmul.f32 %v289_v55, %v289_v55  ;;  %v292_v61 = vld [vmem:[#allocation2 + $0x18] sm:$0xff]  ;;  %274 = vst.msk [vmem:[#allocation2 + $0x20] sm:$0xff] %vm18_vm0, %v257_v50  ;;  %v258_v62 = vadd.f32 %v209_v57, %v40_v46  ;;  %282 = vst.msk [vmem:[#allocation2 + $0x60] sm:$0xff] %vm18_vm0, %v265_v52  ;;  %v692_v3 = vld [vmem:[#allocation2 + $0x40] sm:$0xff]  ;;  %v386_v4 = vsel %vm18_vm0, %v289_v55, 0.0 }
  0xee   :  { %372 = vst.msk [vmem:[%s830_s2 + $0x8] sm:$0xf] %vm369_vm3, %v524_v54  ;;  %v525_v1 = vpack.c.bf16 %v292_v61, %v292_v61  ;;  %v290_v2 = vld [vmem:[#allocation2 + $0x8] sm:$0xff]  ;;  %v701_v8 = vld [vmem:[#allocation2 + $0x58] sm:$0xff]  ;;  %v428_v9 = vmul.f32 %v292_v61, %v292_v61  ;;  %v532_v11 = vpack.c.bf16 %v684_v63, %v684_v63  ;;  %v389_v13 = vsel %vm18_vm0, %v291_v49, 0.0 }
  0xef   :  { %277 = vst.msk [vmem:[#allocation2 + $0x38] sm:$0xff] %vm18_vm0, %v260_v56  ;;  %v523_v5 = vpack.c.bf16 %v290_v2, %v290_v2  ;;  %v387_v6 = vsel %vm18_vm0, %v290_v2, 0.0  ;;  %v426_v7 = vmul.f32 %v290_v2, %v290_v2  ;;  %275 = vst.msk [vmem:[#allocation2 + $0x28] sm:$0xff] %vm18_vm0, %v258_v62  ;;  %v709_v12 = vld [vmem:[#allocation2 + $0x48] sm:$0xff]  ;;  %v441_v14 = vsel %vm18_vm0, %v425_v60, 0.0  ;;  %v50_v47 = vld [vmem:[#allocation2 + $0x78] sm:$0xff] }
  0xf0   :  { %370 = vst.msk [vmem:[%s830_s2] sm:$0xf] %vm369_vm3, %v522_v59  ;;  %373 = vst.msk [vmem:[%s830_s2 + $0xc] sm:$0xf] %vm369_vm3, %v525_v1  ;;  %v388_v10 = vadd.f32 %v387_v6, %v386_v4  ;;  %v530_v16 = vpack.c.bf16 %v692_v3, %v692_v3  ;;  %v533_v19 = vpack.c.bf16 %v701_v8, %v701_v8  ;;  %v444_v20 = vsel %vm18_vm0, %v427_v0, 0.0  ;;  %v48_v52 = vld [vmem:[#allocation2 + $0x68] sm:$0xff] }
  0xf1   :  { %371 = vst.msk [vmem:[%s830_s2 + $0x4] sm:$0xf] %vm369_vm3, %v523_v5  ;;  %v442_v15 = vsel %vm18_vm0, %v426_v7, 0.0  ;;  %380 = vst.msk [vmem:[%s830_s2 + $0x28] sm:$0xf] %vm369_vm3, %v532_v11  ;;  %v531_v22 = vpack.c.bf16 %v709_v12, %v709_v12  ;;  %v391_v23 = vsel %vm18_vm0, %v292_v61, 0.0  ;;  %v433_v46 = vmul.f32 %v692_v3, %v692_v3 }
  0xf2   :  { %v390_v17 = vadd.f32 %v389_v13, %v388_v10  ;;  %v443_v18 = vadd.f32 %v442_v15, %v441_v14  ;;  %378 = vst.msk [vmem:[%s830_s2 + $0x20] sm:$0xf] %vm369_vm3, %v530_v16  ;;  %v446_v24 = vsel %vm18_vm0, %v428_v9, 0.0  ;;  %381 = vst.msk [vmem:[%s830_s2 + $0x2c] sm:$0xf] %vm369_vm3, %v533_v19  ;;  %v401_v60 = vsel %vm18_vm0, %v692_v3, 0.0 }
  0xf3   :  { %v295_v21 = vld [vmem:[#allocation2 + $0x30] sm:$0xff]  ;;  %379 = vst.msk [vmem:[%s830_s2 + $0x24] sm:$0xf] %vm369_vm3, %v531_v22  ;;  %v268_v61 = vadd.f32 %v677_v53, %v50_v47  ;;  %v266_v1 = vadd.f32 %v681_v58, %v48_v52  ;;  %v456_v3 = vsel %vm18_vm0, %v433_v46, 0.0  ;;  %v434_v4 = vmul.f32 %v709_v12, %v709_v12 }
  0xf4   :  { %v445_v25 = vadd.f32 %v444_v20, %v443_v18  ;;  %v528_v26 = vpack.c.bf16 %v295_v21, %v295_v21  ;;  %v293_v27 = vld [vmem:[#allocation2 + $0x20] sm:$0xff]  ;;  %v392_v29 = vadd.f32 %v391_v23, %v390_v17  ;;  %v753_v39 = vld [vmem:[#allocation2 + $0x70] sm:$0xff]  ;;  %v431_v40 = vmul.f32 %v295_v21, %v295_v21 }
  0xf5   :  { %v526_v28 = vpack.c.bf16 %v293_v27, %v293_v27  ;;  %v393_v30 = vsel %vm18_vm0, %v293_v27, 0.0  ;;  %v429_v31 = vmul.f32 %v293_v27, %v293_v27  ;;  %v301_v44 = vld [vmem:[#allocation2 + $0x60] sm:$0xff]  ;;  %v397_v48 = vsel %vm18_vm0, %v295_v21, 0.0  ;;  %285 = vst.msk [vmem:[#allocation2 + $0x78] sm:$0xff] %vm18_vm0, %v268_v61  ;;  %283 = vst.msk [vmem:[#allocation2 + $0x68] sm:$0xff] %vm18_vm0, %v266_v1 }
  0xf6   :  { %v296_v32 = vld [vmem:[#allocation2 + $0x38] sm:$0xff]  ;;  %376 = vst.msk [vmem:[%s830_s2 + $0x18] sm:$0xf] %vm369_vm3, %v528_v26  ;;  %v447_v33 = vadd.f32 %v446_v24, %v445_v25  ;;  %v294_v35 = vld [vmem:[#allocation2 + $0x28] sm:$0xff]  ;;  %v394_v36 = vadd.f32 %v393_v30, %v392_v29  ;;  %v536_v51 = vpack.c.bf16 %v753_v39, %v753_v39  ;;  %v534_v56 = vpack.c.bf16 %v301_v44, %v301_v44 }
  0xf7   :  { %v529_v34 = vpack.c.bf16 %v296_v32, %v296_v32  ;;  %374 = vst.msk [vmem:[%s830_s2 + $0x10] sm:$0xf] %vm369_vm3, %v526_v28  ;;  %v448_v37 = vsel %vm18_vm0, %v429_v31, 0.0  ;;  %v527_v38 = vpack.c.bf16 %v294_v35, %v294_v35  ;;  %v395_v42 = vsel %vm18_vm0, %v294_v35, 0.0 }
  0xf8   :  { %v449_v41 = vadd.f32 %v448_v37, %v447_v33  ;;  %v430_v43 = vmul.f32 %v294_v35, %v294_v35  ;;  %v396_v45 = vadd.f32 %v395_v42, %v394_v36  ;;  %v432_v49 = vmul.f32 %v296_v32, %v296_v32  ;;  %384 = vst.msk [vmem:[%s830_s2 + $0x38] sm:$0xf] %vm369_vm3, %v536_v51 }
  0xf9   :  { %377 = vst.msk [vmem:[%s830_s2 + $0x1c] sm:$0xf] %vm369_vm3, %v529_v34  ;;  %375 = vst.msk [vmem:[%s830_s2 + $0x14] sm:$0xf] %vm369_vm3, %v527_v38  ;;  %v452_v57 = vsel %vm18_vm0, %v431_v40, 0.0  ;;  %v399_v59 = vsel %vm18_vm0, %v296_v32, 0.0  ;;  %v435_v6 = vmul.f32 %v684_v63, %v684_v63  ;;  %v436_v11 = vmul.f32 %v701_v8, %v701_v8 }
  0xfa   :  { %v450_v50 = vsel %vm18_vm0, %v430_v43, 0.0  ;;  %v398_v54 = vadd.f32 %v397_v48, %v396_v45  ;;  %382 = vst.msk [vmem:[%s830_s2 + $0x30] sm:$0xf] %vm369_vm3, %v534_v56  ;;  %v454_v2 = vsel %vm18_vm0, %v432_v49, 0.0  ;;  %v403_v7 = vsel %vm18_vm0, %v709_v12, 0.0 }
  0xfb   :  { %v451_v55 = vadd.f32 %v450_v50, %v449_v41  ;;  %v405_v10 = vsel %vm18_vm0, %v684_v63, 0.0  ;;  %v458_v13 = vsel %vm18_vm0, %v434_v4, 0.0  ;;  %v437_v14 = vmul.f32 %v301_v44, %v301_v44 }
  0xfc   :  { %v400_v0 = vadd.f32 %v399_v59, %v398_v54  ;;  %v460_v17 = vsel %vm18_vm0, %v435_v6, 0.0  ;;  %v407_v18 = vsel %vm18_vm0, %v701_v8, 0.0  ;;  %v409_v12 = vsel %vm18_vm0, %v301_v44, 0.0  ;;  %v304_v21 = vld [vmem:[#allocation2 + $0x78] sm:$0xff]  ;;  %v302_v24 = vld [vmem:[#allocation2 + $0x68] sm:$0xff] }
  0xfd   :  { %v453_v62 = vadd.f32 %v452_v57, %v451_v55  ;;  %v462_v63 = vsel %vm18_vm0, %v436_v11, 0.0  ;;  %v464_v22 = vsel %vm18_vm0, %v437_v14, 0.0  ;;  %v537_v23 = vpack.c.bf16 %v304_v21, %v304_v21 }
  0xfe   :  { %v402_v5 = vadd.f32 %v401_v60, %v400_v0  ;;  %v535_v27 = vpack.c.bf16 %v302_v24, %v302_v24  ;;  %v439_v28 = vmul.f32 %v753_v39, %v753_v39  ;;  %v411_v8 = vsel %vm18_vm0, %v302_v24, 0.0 }
  0xff   :  { %v455_v53 = vadd.f32 %v454_v2, %v453_v62  ;;  %385 = vst.msk [vmem:[%s830_s2 + $0x3c] sm:$0xf] %vm369_vm3, %v537_v23  ;;  %v438_v29 = vmul.f32 %v302_v24, %v302_v24  ;;  %v413_v32 = vsel %vm18_vm0, %v753_v39, 0.0  ;;  %v440_v33 = vmul.f32 %v304_v21, %v304_v21 }
 0x100   :  { %v404_v9 = vadd.f32 %v403_v7, %v402_v5  ;;  %383 = vst.msk [vmem:[%s830_s2 + $0x34] sm:$0xf] %vm369_vm3, %v535_v27  ;;  %v468_v37 = vsel %vm18_vm0, %v439_v28, 0.0  ;;  %v415_v38 = vsel %vm18_vm0, %v304_v21, 0.0 }
 0x101   :  { %v457_v58 = vadd.f32 %v456_v3, %v455_v53  ;;  %v466_v34 = vsel %vm18_vm0, %v438_v29, 0.0  ;;  %v470_v42 = vsel %vm18_vm0, %v440_v33, 0.0 }
 0x102   :  { %v406_v15 = vadd.f32 %v405_v10, %v404_v9 }
 0x103   :  { %v459_v16 = vadd.f32 %v458_v13, %v457_v58 }
 0x104   :  { %v408_v20 = vadd.f32 %v407_v18, %v406_v15 }
 0x105   :  { %v461_v19 = vadd.f32 %v460_v17, %v459_v16 }
 0x106   :  { %v410_v25 = vadd.f32 %v409_v12, %v408_v20 }
 0x107   :  { %v463_v26 = vadd.f32 %v462_v63, %v461_v19 }
 0x108   :  { %v412_v31 = vadd.f32 %v411_v8, %v410_v25 }
 0x109   :  { %v465_v30 = vadd.f32 %v464_v22, %v463_v26 }
 0x10a   :  { %v414_v35 = vadd.f32 %v413_v32, %v412_v31 }
 0x10b   :  { %v467_v36 = vadd.f32 %v466_v34, %v465_v30 }
 0x10c   :  { %v416_v40 = vadd.f32 %v415_v38, %v414_v35 }
 0x10d   :  { %v469_v41 = vadd.f32 %v468_v37, %v467_v36 }
 0x10e   :  { %v417_v43 = vrot.slane %v416_v40, 4 }
 0x10f   :  { %v471_v44 = vadd.f32 %v470_v42, %v469_v41 }
 0x110   :  { %v418_v45 = vadd.f32 %v417_v43, %v416_v40 }
 0x111   :  { %v472_v46 = vrot.slane %v471_v44, 4 }
 0x112   :  { %v419_v47 = vrot.slane %v418_v45, 2 }
 0x113   :  { %v473_v48 = vadd.f32 %v472_v46, %v471_v44 }
 0x114   :  { %v420_v39 = vadd.f32 %v419_v47, %v418_v45 }
 0x115   :  { %v474_v49 = vrot.slane %v473_v48, 2 }
 0x116   :  { %v421_v50 = vrot.slane %v420_v39, 1 }
 0x117   :  { %v475_v51 = vadd.f32 %v474_v49, %v473_v48 }
 0x118   :  { %v422_v52 = vadd.f32 %v421_v50, %v420_v39 }
 0x119   :  { %v476_v54 = vrot.slane %v475_v51, 1 }
 0x11a   :  { %424 = vst.msk [vmem:[%s831_s3] sm:$0x1] %vm423_vm4, %v422_v52 }
 0x11b   :  { %v477_v55 = vadd.f32 %v476_v54, %v475_v51 }
 0x11d   :  { %478 = vst.msk [vmem:[%s831_s3 + $0x1] sm:$0x1] %vm423_vm4, %v477_v55 }

// kernel: basic_block_forward.7
= control target key start
LH: loop header
LB: loop body
LE: loop exit
PB: predicated region body
PF: predicated region fallthrough
CT: control target
= control target key end

     0   :  { %vm18_vm0 = vcmask 64512   ;;  %v621_v1 = vmov 0.0   ;;  %vm143_vm1 = vcmask 588800   ;;  %vm168_vm2 = vcmask 1043456   ;;  %s864_s1 = inlined_call_operand.vmem [shape: bf16[72,8], index: 1, kind: input, shape index: {}]   ;;  %s865_s0 = inlined_call_operand.vmem [shape: bf16[128,72], index: 0, kind: input, shape index: {}]   ;;  %s866_s2 = inlined_call_operand.vmem [shape: bf16[128,8], index: 2, kind: output, shape index: {0}]   ;;  %s867_s3 = inlined_call_operand.vmem [shape: f32[8,8], index: 3, kind: output, shape index: {1}]  }
   0x1   :  { %v608_v0 = vld [vmem:[%s864_s1] sm:$0xff]   ;;  %21 = vst.msk [vmem:[#allocation2 + $0x10] sm:$0xff] %vm18_vm0, %v621_v1  ;;  %19 = vst.msk [vmem:[#allocation2] sm:$0xff] %vm18_vm0, %v621_v1  ;;  %v609_v2 = vld [vmem:[%s864_s1 + $0x8] sm:$0xff]   ;;  %vm385_vm3 = vcmask 60416   ;;  %vm439_vm4 = vcmask 57344  }
   0x2   :  { %20 = vst.msk [vmem:[#allocation2 + $0x8] sm:$0xff] %vm18_vm0, %v621_v1  ;;  %22 = vst.msk [vmem:[#allocation2 + $0x18] sm:$0xff] %vm18_vm0, %v621_v1  ;;  %569 = vmatprep.subr.bf16.mxu0 %v608_v0  ;;  %595 = vmatprep.subr.bf16.mxu1 %v608_v0  ;;  %v610_v3 = vld [vmem:[%s864_s1 + $0x10] sm:$0xff]   ;;  %v613_v4 = vld [vmem:[%s865_s0] sm:$0xff]  }
   0x3   :  { %23 = vst.msk [vmem:[#allocation2 + $0x20] sm:$0xff] %vm18_vm0, %v621_v1  ;;  %24 = vst.msk [vmem:[#allocation2 + $0x28] sm:$0xff] %vm18_vm0, %v621_v1  ;;  %570 = vmatpush3.bf16.msra.mxu0 %v608_v0  ;;  %600 = vmatpush3.bf16.msra.mxu1 %v608_v0  ;;  %v611_v5 = vld [vmem:[%s864_s1 + $0x18] sm:$0xff]   ;;  %v617_v6 = vld [vmem:[%s865_s0 + $0x20] sm:$0xff]  }
   0x4   :  { %25 = vst.msk [vmem:[#allocation2 + $0x30] sm:$0xff] %vm18_vm0, %v621_v1  ;;  %26 = vst.msk [vmem:[#allocation2 + $0x38] sm:$0xff] %vm18_vm0, %v621_v1  ;;  %571 = vmatprep.subr.bf16.mxu0 %v609_v2  ;;  %596 = vmatprep.subr.bf16.mxu1 %v609_v2  ;;  %v612_v7 = vld [vmem:[%s864_s1 + $0x20] ss:$0 sps:$4 sm:$0xff]   ;;  %v614_v9 = vld [vmem:[%s865_s0 + $0x8] sm:$0xff]  }
   0x5   :  { %27 = vst.msk [vmem:[#allocation2 + $0x40] sm:$0xff] %vm18_vm0, %v621_v1  ;;  %28 = vst.msk [vmem:[#allocation2 + $0x48] sm:$0xff] %vm18_vm0, %v621_v1  ;;  %579 = vmatprep.mubr.msk.bf16.mxu0 %vm143_vm1, %v613_v4  ;;  %587 = vmatprep.mubr.msk.bf16.mxu1 %vm143_vm1, %v617_v6  ;;  %v170_v8 = vsel %vm168_vm2, %v612_v7, 0  ;;  %v618_v10 = vld [vmem:[%s865_s0 + $0x28] sm:$0xff]   ;;  %v615_v11 = vld [vmem:[%s865_s0 + $0x10] sm:$0xff]  }
   0x6   :  { %29 = vst.msk [vmem:[#allocation2 + $0x50] sm:$0xff] %vm18_vm0, %v621_v1  ;;  %30 = vst.msk [vmem:[#allocation2 + $0x58] sm:$0xff] %vm18_vm0, %v621_v1  ;;  %v619_v12 = vld [vmem:[%s865_s0 + $0x30] sm:$0xff]   ;;  %v616_v13 = vld [vmem:[%s865_s0 + $0x18] sm:$0xff]  }
   0x7   :  { %31 = vst.msk [vmem:[#allocation2 + $0x60] sm:$0xff] %vm18_vm0, %v621_v1  ;;  %32 = vst.msk [vmem:[#allocation2 + $0x68] sm:$0xff] %vm18_vm0, %v621_v1  ;;  %572 = vmatpush3.bf16.msra.mxu0 %v609_v2  ;;  %601 = vmatpush3.bf16.msra.mxu1 %v609_v2  ;;  %v620_v14 = vld [vmem:[%s865_s0 + $0x38] sm:$0xff]  }
   0x8   :  { %33 = vst.msk [vmem:[#allocation2 + $0x70] sm:$0xff] %vm18_vm0, %v621_v1  ;;  %34 = vst.msk [vmem:[#allocation2 + $0x78] sm:$0xff] %vm18_vm0, %v621_v1  ;;  %573 = vmatprep.subr.bf16.mxu0 %v610_v3  ;;  %597 = vmatprep.subr.bf16.mxu1 %v610_v3  ;;  %v37_v15 = vld [vmem:[#allocation2 + $0x10] sm:$0xff]  ;;  %v35_v17 = vld [vmem:[#allocation2] sm:$0xff] }
   0x9   :  { %v38_v20 = vld [vmem:[#allocation2 + $0x18] sm:$0xff]  ;;  %v36_v25 = vld [vmem:[#allocation2 + $0x8] sm:$0xff] }
   0xa   :  { %v39_v41 = vld [vmem:[#allocation2 + $0x20] sm:$0xff]  ;;  %v40_v48 = vld [vmem:[#allocation2 + $0x28] sm:$0xff] }
   0xb   :  { %574 = vmatpush3.bf16.msra.mxu0 %v610_v3  ;;  %602 = vmatpush3.bf16.msra.mxu1 %v610_v3  ;;  %v41_v39 = vld [vmem:[#allocation2 + $0x30] sm:$0xff]  ;;  %v42_v44 = vld [vmem:[#allocation2 + $0x38] sm:$0xff] }
   0xc   :  { %575 = vmatprep.subr.bf16.mxu0 %v611_v5  ;;  %598 = vmatprep.subr.bf16.mxu1 %v611_v5  ;;  %v43_v18 = vld [vmem:[#allocation2 + $0x40] sm:$0xff]  ;;  %v44_v28 = vld [vmem:[#allocation2 + $0x48] sm:$0xff] }
   0xd   :  { %v45_v16 = vld [vmem:[#allocation2 + $0x50] sm:$0xff]  ;;  %v46_v22 = vld [vmem:[#allocation2 + $0x58] sm:$0xff] }
   0xe   :  { %v47_v42 = vld [vmem:[#allocation2 + $0x60] sm:$0xff] }
   0xf   :  { %576 = vmatpush3.bf16.msra.mxu0 %v611_v5  ;;  %603 = vmatpush3.bf16.msra.mxu1 %v611_v5  ;;  %v49_v40 = vld [vmem:[#allocation2 + $0x70] sm:$0xff] }
  0x10   :  { %605 = vmatprep.subr.msk.bf16.mxu0 %vm168_vm2, %v612_v7  ;;  %606 = vmatprep.subr.msk.bf16.mxu1 %vm168_vm2, %v612_v7 }
  0x13   :  { %578 = vmatpush3.bf16.msra.mxu0 %v170_v8  ;;  %604 = vmatpush3.bf16.msra.mxu1 %v170_v8 }
  0x16   :  { %580 = vmatmul.mubr.msk.bf16.vlgmr.msra.gmra.mrb[0].mxu0 %vm143_vm1, %v614_v9  ;;  %588 = vmatmul.mubr.msk.bf16.vlgmr.msra.gmra.mrb[0].mxu1 %vm143_vm1, %v618_v10 }
  0x17   :  { %583 = vmatprep.mubr.msk.bf16.mxu0 %vm143_vm1, %v615_v11  ;;  %591 = vmatprep.mubr.msk.bf16.mxu1 %vm143_vm1, %v619_v12 }
  0x1e   :  { %584 = vmatmul.mubr.msk.bf16.gmra.mrb[4].mxu0 %vm143_vm1, %v616_v13  ;;  %592 = vmatmul.mubr.msk.bf16.gmra.mrb[4].mxu1 %vm143_vm1, %v620_v14 }
  0xe9   :  { %v581_v19 = vpop.f32.mrb[0].mxu0  ;;  %v589_v21 = vpop.f32.mrb[0].mxu1 }
  0xea   :  { %v271_v23 = vadd.f32 %v581_v19, %v37_v15  ;;  %v206_v24 = vpop.f32.mrb[1].mxu0  ;;  %v279_v26 = vadd.f32 %v589_v21, %v45_v16  ;;  %v238_v27 = vpop.f32.mrb[1].mxu1 }
  0xeb   :  { %v269_v29 = vadd.f32 %v206_v24, %v35_v17  ;;  %v582_v30 = vpop.f32.mrb[2].mxu0  ;;  %v277_v31 = vadd.f32 %v238_v27, %v43_v18  ;;  %v590_v32 = vpop.f32.mrb[2].mxu1 }
  0xec   :  { %288 = vst.msk [vmem:[#allocation2 + $0x10] sm:$0xff] %vm18_vm0, %v271_v23  ;;  %v272_v33 = vadd.f32 %v582_v30, %v38_v20  ;;  %v209_v34 = vpop.f32.mrb[3].mxu0  ;;  %296 = vst.msk [vmem:[#allocation2 + $0x50] sm:$0xff] %vm18_vm0, %v279_v26  ;;  %v280_v35 = vadd.f32 %v590_v32, %v46_v22  ;;  %v241_v36 = vpop.f32.mrb[3].mxu1 }
  0xed   :  { %286 = vst.msk [vmem:[#allocation2] sm:$0xff] %vm18_vm0, %v269_v29  ;;  %v270_v37 = vadd.f32 %v209_v34, %v36_v25  ;;  %294 = vst.msk [vmem:[#allocation2 + $0x40] sm:$0xff] %vm18_vm0, %v277_v31  ;;  %v278_v38 = vadd.f32 %v241_v36, %v44_v28 }
  0xee   :  { %289 = vst.msk [vmem:[#allocation2 + $0x18] sm:$0xff] %vm18_vm0, %v272_v33  ;;  %297 = vst.msk [vmem:[#allocation2 + $0x58] sm:$0xff] %vm18_vm0, %v280_v35 }
  0xef   :  { %287 = vst.msk [vmem:[#allocation2 + $0x8] sm:$0xff] %vm18_vm0, %v270_v37  ;;  %295 = vst.msk [vmem:[#allocation2 + $0x48] sm:$0xff] %vm18_vm0, %v278_v38 }
  0xf1   :  { %v585_v43 = vpop.f32.mrb[4].mxu0  ;;  %v593_v45 = vpop.f32.mrb[4].mxu1 }
  0xf2   :  { %v275_v46 = vadd.f32 %v585_v43, %v41_v39  ;;  %v222_v47 = vpop.f32.mrb[5].mxu0  ;;  %v283_v49 = vadd.f32 %v593_v45, %v49_v40  ;;  %v254_v50 = vpop.f32.mrb[5].mxu1 }
  0xf3   :  { %v307_v51 = vld [vmem:[#allocation2 + $0x10] sm:$0xff]  ;;  %v273_v52 = vadd.f32 %v222_v47, %v39_v41  ;;  %v586_v53 = vpop.f32.mrb[6].mxu0  ;;  %v281_v54 = vadd.f32 %v254_v50, %v47_v42  ;;  %v713_v55 = vpop.f32.mrb[6].mxu1 }
  0xf4   :  { %v542_v56 = vpack.c.bf16 %v307_v51, %v307_v51  ;;  %v305_v57 = vld [vmem:[#allocation2] sm:$0xff]  ;;  %292 = vst.msk [vmem:[#allocation2 + $0x30] sm:$0xff] %vm18_vm0, %v275_v46  ;;  %v276_v58 = vadd.f32 %v586_v53, %v42_v44  ;;  %v225_v59 = vpop.f32.mrb[7].mxu0  ;;  %300 = vst.msk [vmem:[#allocation2 + $0x70] sm:$0xff] %vm18_vm0, %v283_v49  ;;  %v717_v60 = vpop.f32.mrb[7].mxu1  ;;  %v720_v1 = vld [vmem:[#allocation2 + $0x50] sm:$0xff]  ;;  %v443_v2 = vmul.f32 %v307_v51, %v307_v51 }
  0xf5   :  { %v540_v61 = vpack.c.bf16 %v305_v57, %v305_v57  ;;  %v441_v62 = vmul.f32 %v305_v57, %v305_v57  ;;  %v308_v63 = vld [vmem:[#allocation2 + $0x18] sm:$0xff]  ;;  %290 = vst.msk [vmem:[#allocation2 + $0x20] sm:$0xff] %vm18_vm0, %v273_v52  ;;  %v274_v0 = vadd.f32 %v225_v59, %v40_v48  ;;  %298 = vst.msk [vmem:[#allocation2 + $0x60] sm:$0xff] %vm18_vm0, %v281_v54  ;;  %v728_v5 = vld [vmem:[#allocation2 + $0x40] sm:$0xff]  ;;  %v402_v6 = vsel %vm18_vm0, %v305_v57, 0.0 }
  0xf6   :  { %388 = vst.msk [vmem:[%s866_s2 + $0x8] sm:$0xf] %vm385_vm3, %v542_v56  ;;  %v543_v3 = vpack.c.bf16 %v308_v63, %v308_v63  ;;  %v306_v4 = vld [vmem:[#allocation2 + $0x8] sm:$0xff]  ;;  %v737_v10 = vld [vmem:[#allocation2 + $0x58] sm:$0xff]  ;;  %v444_v11 = vmul.f32 %v308_v63, %v308_v63  ;;  %v550_v13 = vpack.c.bf16 %v720_v1, %v720_v1  ;;  %v405_v15 = vsel %vm18_vm0, %v307_v51, 0.0 }
  0xf7   :  { %293 = vst.msk [vmem:[#allocation2 + $0x38] sm:$0xff] %vm18_vm0, %v276_v58  ;;  %v541_v7 = vpack.c.bf16 %v306_v4, %v306_v4  ;;  %v403_v8 = vsel %vm18_vm0, %v306_v4, 0.0  ;;  %v442_v9 = vmul.f32 %v306_v4, %v306_v4  ;;  %291 = vst.msk [vmem:[#allocation2 + $0x28] sm:$0xff] %vm18_vm0, %v274_v0  ;;  %v745_v14 = vld [vmem:[#allocation2 + $0x48] sm:$0xff]  ;;  %v457_v16 = vsel %vm18_vm0, %v441_v62, 0.0  ;;  %v50_v49 = vld [vmem:[#allocation2 + $0x78] sm:$0xff] }
  0xf8   :  { %386 = vst.msk [vmem:[%s866_s2] sm:$0xf] %vm385_vm3, %v540_v61  ;;  %389 = vst.msk [vmem:[%s866_s2 + $0xc] sm:$0xf] %vm385_vm3, %v543_v3  ;;  %v404_v12 = vadd.f32 %v403_v8, %v402_v6  ;;  %v548_v18 = vpack.c.bf16 %v728_v5, %v728_v5  ;;  %v551_v21 = vpack.c.bf16 %v737_v10, %v737_v10  ;;  %v460_v22 = vsel %vm18_vm0, %v443_v2, 0.0  ;;  %v48_v54 = vld [vmem:[#allocation2 + $0x68] sm:$0xff] }
  0xf9   :  { %387 = vst.msk [vmem:[%s866_s2 + $0x4] sm:$0xf] %vm385_vm3, %v541_v7  ;;  %v458_v17 = vsel %vm18_vm0, %v442_v9, 0.0  ;;  %396 = vst.msk [vmem:[%s866_s2 + $0x28] sm:$0xf] %vm385_vm3, %v550_v13  ;;  %v549_v24 = vpack.c.bf16 %v745_v14, %v745_v14  ;;  %v407_v25 = vsel %vm18_vm0, %v308_v63, 0.0  ;;  %v449_v48 = vmul.f32 %v728_v5, %v728_v5 }
  0xfa   :  { %v406_v19 = vadd.f32 %v405_v15, %v404_v12  ;;  %v459_v20 = vadd.f32 %v458_v17, %v457_v16  ;;  %394 = vst.msk [vmem:[%s866_s2 + $0x20] sm:$0xf] %vm385_vm3, %v548_v18  ;;  %v462_v26 = vsel %vm18_vm0, %v444_v11, 0.0  ;;  %397 = vst.msk [vmem:[%s866_s2 + $0x2c] sm:$0xf] %vm385_vm3, %v551_v21  ;;  %v417_v62 = vsel %vm18_vm0, %v728_v5, 0.0 }
  0xfb   :  { %v311_v23 = vld [vmem:[#allocation2 + $0x30] sm:$0xff]  ;;  %395 = vst.msk [vmem:[%s866_s2 + $0x24] sm:$0xf] %vm385_vm3, %v549_v24  ;;  %v284_v63 = vadd.f32 %v713_v55, %v50_v49  ;;  %v282_v3 = vadd.f32 %v717_v60, %v48_v54  ;;  %v472_v5 = vsel %vm18_vm0, %v449_v48, 0.0  ;;  %v450_v6 = vmul.f32 %v745_v14, %v745_v14 }
  0xfc   :  { %v461_v27 = vadd.f32 %v460_v22, %v459_v20  ;;  %v546_v28 = vpack.c.bf16 %v311_v23, %v311_v23  ;;  %v309_v29 = vld [vmem:[#allocation2 + $0x20] sm:$0xff]  ;;  %v408_v31 = vadd.f32 %v407_v25, %v406_v19  ;;  %v789_v41 = vld [vmem:[#allocation2 + $0x70] sm:$0xff]  ;;  %v447_v42 = vmul.f32 %v311_v23, %v311_v23 }
  0xfd   :  { %v544_v30 = vpack.c.bf16 %v309_v29, %v309_v29  ;;  %v409_v32 = vsel %vm18_vm0, %v309_v29, 0.0  ;;  %v445_v33 = vmul.f32 %v309_v29, %v309_v29  ;;  %v317_v46 = vld [vmem:[#allocation2 + $0x60] sm:$0xff]  ;;  %v413_v50 = vsel %vm18_vm0, %v311_v23, 0.0  ;;  %301 = vst.msk [vmem:[#allocation2 + $0x78] sm:$0xff] %vm18_vm0, %v284_v63  ;;  %299 = vst.msk [vmem:[#allocation2 + $0x68] sm:$0xff] %vm18_vm0, %v282_v3 }
  0xfe   :  { %v312_v34 = vld [vmem:[#allocation2 + $0x38] sm:$0xff]  ;;  %392 = vst.msk [vmem:[%s866_s2 + $0x18] sm:$0xf] %vm385_vm3, %v546_v28  ;;  %v463_v35 = vadd.f32 %v462_v26, %v461_v27  ;;  %v310_v37 = vld [vmem:[#allocation2 + $0x28] sm:$0xff]  ;;  %v410_v38 = vadd.f32 %v409_v32, %v408_v31  ;;  %v554_v53 = vpack.c.bf16 %v789_v41, %v789_v41  ;;  %v552_v58 = vpack.c.bf16 %v317_v46, %v317_v46 }
  0xff   :  { %v547_v36 = vpack.c.bf16 %v312_v34, %v312_v34  ;;  %390 = vst.msk [vmem:[%s866_s2 + $0x10] sm:$0xf] %vm385_vm3, %v544_v30  ;;  %v464_v39 = vsel %vm18_vm0, %v445_v33, 0.0  ;;  %v545_v40 = vpack.c.bf16 %v310_v37, %v310_v37  ;;  %v411_v44 = vsel %vm18_vm0, %v310_v37, 0.0 }
 0x100   :  { %v465_v43 = vadd.f32 %v464_v39, %v463_v35  ;;  %v446_v45 = vmul.f32 %v310_v37, %v310_v37  ;;  %v412_v47 = vadd.f32 %v411_v44, %v410_v38  ;;  %v448_v51 = vmul.f32 %v312_v34, %v312_v34  ;;  %400 = vst.msk [vmem:[%s866_s2 + $0x38] sm:$0xf] %vm385_vm3, %v554_v53 }
 0x101   :  { %393 = vst.msk [vmem:[%s866_s2 + $0x1c] sm:$0xf] %vm385_vm3, %v547_v36  ;;  %391 = vst.msk [vmem:[%s866_s2 + $0x14] sm:$0xf] %vm385_vm3, %v545_v40  ;;  %v468_v59 = vsel %vm18_vm0, %v447_v42, 0.0  ;;  %v415_v61 = vsel %vm18_vm0, %v312_v34, 0.0  ;;  %v451_v8 = vmul.f32 %v720_v1, %v720_v1  ;;  %v452_v13 = vmul.f32 %v737_v10, %v737_v10 }
 0x102   :  { %v466_v52 = vsel %vm18_vm0, %v446_v45, 0.0  ;;  %v414_v56 = vadd.f32 %v413_v50, %v412_v47  ;;  %398 = vst.msk [vmem:[%s866_s2 + $0x30] sm:$0xf] %vm385_vm3, %v552_v58  ;;  %v470_v4 = vsel %vm18_vm0, %v448_v51, 0.0  ;;  %v419_v9 = vsel %vm18_vm0, %v745_v14, 0.0 }
 0x103   :  { %v467_v57 = vadd.f32 %v466_v52, %v465_v43  ;;  %v421_v12 = vsel %vm18_vm0, %v720_v1, 0.0  ;;  %v474_v15 = vsel %vm18_vm0, %v450_v6, 0.0  ;;  %v453_v16 = vmul.f32 %v317_v46, %v317_v46 }
 0x104   :  { %v416_v2 = vadd.f32 %v415_v61, %v414_v56  ;;  %v476_v19 = vsel %vm18_vm0, %v451_v8, 0.0  ;;  %v423_v20 = vsel %vm18_vm0, %v737_v10, 0.0  ;;  %v425_v14 = vsel %vm18_vm0, %v317_v46, 0.0  ;;  %v320_v23 = vld [vmem:[#allocation2 + $0x78] sm:$0xff]  ;;  %v318_v26 = vld [vmem:[#allocation2 + $0x68] sm:$0xff] }
 0x105   :  { %v469_v0 = vadd.f32 %v468_v59, %v467_v57  ;;  %v478_v1 = vsel %vm18_vm0, %v452_v13, 0.0  ;;  %v480_v24 = vsel %vm18_vm0, %v453_v16, 0.0  ;;  %v555_v25 = vpack.c.bf16 %v320_v23, %v320_v23 }
 0x106   :  { %v418_v7 = vadd.f32 %v417_v62, %v416_v2  ;;  %v553_v29 = vpack.c.bf16 %v318_v26, %v318_v26  ;;  %v455_v30 = vmul.f32 %v789_v41, %v789_v41  ;;  %v427_v10 = vsel %vm18_vm0, %v318_v26, 0.0 }
 0x107   :  { %v471_v55 = vadd.f32 %v470_v4, %v469_v0  ;;  %401 = vst.msk [vmem:[%s866_s2 + $0x3c] sm:$0xf] %vm385_vm3, %v555_v25  ;;  %v454_v31 = vmul.f32 %v318_v26, %v318_v26  ;;  %v429_v34 = vsel %vm18_vm0, %v789_v41, 0.0  ;;  %v456_v35 = vmul.f32 %v320_v23, %v320_v23 }
 0x108   :  { %v420_v11 = vadd.f32 %v419_v9, %v418_v7  ;;  %399 = vst.msk [vmem:[%s866_s2 + $0x34] sm:$0xf] %vm385_vm3, %v553_v29  ;;  %v484_v39 = vsel %vm18_vm0, %v455_v30, 0.0  ;;  %v431_v40 = vsel %vm18_vm0, %v320_v23, 0.0 }
 0x109   :  { %v473_v60 = vadd.f32 %v472_v5, %v471_v55  ;;  %v482_v36 = vsel %vm18_vm0, %v454_v31, 0.0  ;;  %v486_v44 = vsel %vm18_vm0, %v456_v35, 0.0 }
 0x10a   :  { %v422_v17 = vadd.f32 %v421_v12, %v420_v11 }
 0x10b   :  { %v475_v18 = vadd.f32 %v474_v15, %v473_v60 }
 0x10c   :  { %v424_v22 = vadd.f32 %v423_v20, %v422_v17 }
 0x10d   :  { %v477_v21 = vadd.f32 %v476_v19, %v475_v18 }
 0x10e   :  { %v426_v27 = vadd.f32 %v425_v14, %v424_v22 }
 0x10f   :  { %v479_v28 = vadd.f32 %v478_v1, %v477_v21 }
 0x110   :  { %v428_v33 = vadd.f32 %v427_v10, %v426_v27 }
 0x111   :  { %v481_v32 = vadd.f32 %v480_v24, %v479_v28 }
 0x112   :  { %v430_v37 = vadd.f32 %v429_v34, %v428_v33 }
 0x113   :  { %v483_v38 = vadd.f32 %v482_v36, %v481_v32 }
 0x114   :  { %v432_v42 = vadd.f32 %v431_v40, %v430_v37 }
 0x115   :  { %v485_v43 = vadd.f32 %v484_v39, %v483_v38 }
 0x116   :  { %v433_v45 = vrot.slane %v432_v42, 4 }
 0x117   :  { %v487_v46 = vadd.f32 %v486_v44, %v485_v43 }
 0x118   :  { %v434_v47 = vadd.f32 %v433_v45, %v432_v42 }
 0x119   :  { %v488_v48 = vrot.slane %v487_v46, 4 }
 0x11a   :  { %v435_v49 = vrot.slane %v434_v47, 2 }
 0x11b   :  { %v489_v50 = vadd.f32 %v488_v48, %v487_v46 }
 0x11c   :  { %v436_v41 = vadd.f32 %v435_v49, %v434_v47 }
 0x11d   :  { %v490_v51 = vrot.slane %v489_v50, 2 }
 0x11e   :  { %v437_v52 = vrot.slane %v436_v41, 1 }
 0x11f   :  { %v491_v53 = vadd.f32 %v490_v51, %v489_v50 }
 0x120   :  { %v438_v54 = vadd.f32 %v437_v52, %v436_v41 }
 0x121   :  { %v492_v56 = vrot.slane %v491_v53, 1 }
 0x122   :  { %440 = vst.msk [vmem:[%s867_s3] sm:$0x1] %vm439_vm4, %v438_v54 }
 0x123   :  { %v493_v57 = vadd.f32 %v492_v56, %v491_v53 }
 0x125   :  { %494 = vst.msk [vmem:[%s867_s3 + $0x1] sm:$0x1] %vm439_vm4, %v493_v57 }

// kernel: basic_block_forward.8
= control target key start
LH: loop header
LB: loop body
LE: loop exit
PB: predicated region body
PF: predicated region fallthrough
CT: control target
= control target key end

     0   :  { %vm133_vm0 = vcmask 1041408   ;;  %vm108_vm1 = vcmask 31744   ;;  %vm18_vm2 = vcmask 64512   ;;  %v556_v1 = vmov 0.0   ;;  %s786_s1 = inlined_call_operand.vmem [shape: bf16[4,8], index: 1, kind: input, shape index: {}]   ;;  %s787_s0 = inlined_call_operand.vmem [shape: bf16[128,4], index: 0, kind: input, shape index: {}]   ;;  %s788_s2 = inlined_call_operand.vmem [shape: bf16[128,8], index: 2, kind: output, shape index: {0}]   ;;  %s789_s3 = inlined_call_operand.vmem [shape: f32[8,8], index: 3, kind: output, shape index: {1}]  }
   0x1   :  { %v67_v0 = vld [vmem:[%s786_s1] sm:$0x3]  ;;  %21 = vst.msk [vmem:[#allocation2 + $0x10] sm:$0xff] %vm18_vm2, %v556_v1  ;;  %19 = vst.msk [vmem:[#allocation2] sm:$0xff] %vm18_vm2, %v556_v1  ;;  %v549_v4 = vld [vmem:[%s787_s0 + $0x8] sm:$0xff]   ;;  %vm350_vm3 = vcmask 60416  }
   0x2   :  { %20 = vst.msk [vmem:[#allocation2 + $0x8] sm:$0xff] %vm18_vm2, %v556_v1  ;;  %22 = vst.msk [vmem:[#allocation2 + $0x18] sm:$0xff] %vm18_vm2, %v556_v1  ;;  %545 = vmatprep.subr.msk.bf16.mxu0 %vm133_vm0, %v67_v0  ;;  %v135_v2 = vsel %vm133_vm0, %v67_v0, 0  ;;  %v548_v3 = vld [vmem:[%s787_s0] sm:$0xff]   ;;  %546 = vmatprep.subr.msk.bf16.mxu1 %vm133_vm0, %v67_v0  ;;  %v550_v5 = vld [vmem:[%s787_s0 + $0x10] sm:$0xff]   ;;  %vm404_vm4 = vcmask 57344  }
   0x3   :  { %23 = vst.msk [vmem:[#allocation2 + $0x20] sm:$0xff] %vm18_vm2, %v556_v1  ;;  %24 = vst.msk [vmem:[#allocation2 + $0x28] sm:$0xff] %vm18_vm2, %v556_v1  ;;  %526 = vmatpush3.bf16.msra.mxu0 %v135_v2  ;;  %544 = vmatpush3.bf16.msra.mxu1 %v135_v2  ;;  %v552_v6 = vld [vmem:[%s787_s0 + $0x20] sm:$0xff]   ;;  %v553_v7 = vld [vmem:[%s787_s0 + $0x28] sm:$0xff]  }
   0x4   :  { %25 = vst.msk [vmem:[#allocation2 + $0x30] sm:$0xff] %vm18_vm2, %v556_v1  ;;  %26 = vst.msk [vmem:[#allocation2 + $0x38] sm:$0xff] %vm18_vm2, %v556_v1  ;;  %527 = vmatprep.mubr.msk.bf16.mxu0 %vm108_vm1, %v548_v3  ;;  %535 = vmatprep.mubr.msk.bf16.mxu1 %vm108_vm1, %v552_v6  ;;  %v554_v8 = vld [vmem:[%s787_s0 + $0x30] sm:$0xff]   ;;  %v551_v9 = vld [vmem:[%s787_s0 + $0x18] sm:$0xff]  }
   0x5   :  { %27 = vst.msk [vmem:[#allocation2 + $0x40] sm:$0xff] %vm18_vm2, %v556_v1  ;;  %28 = vst.msk [vmem:[#allocation2 + $0x48] sm:$0xff] %vm18_vm2, %v556_v1  ;;  %v555_v10 = vld [vmem:[%s787_s0 + $0x38] sm:$0xff]  }
   0x6   :  { %29 = vst.msk [vmem:[#allocation2 + $0x50] sm:$0xff] %vm18_vm2, %v556_v1  ;;  %30 = vst.msk [vmem:[#allocation2 + $0x58] sm:$0xff] %vm18_vm2, %v556_v1  ;;  %528 = vmatmul.mubr.msk.bf16.vlgmr.msra.gmra.mrb[0].mxu0 %vm108_vm1, %v549_v4  ;;  %536 = vmatmul.mubr.msk.bf16.vlgmr.msra.gmra.mrb[0].mxu1 %vm108_vm1, %v553_v7 }
   0x7   :  { %31 = vst.msk [vmem:[#allocation2 + $0x60] sm:$0xff] %vm18_vm2, %v556_v1  ;;  %32 = vst.msk [vmem:[#allocation2 + $0x68] sm:$0xff] %vm18_vm2, %v556_v1  ;;  %531 = vmatprep.mubr.msk.bf16.mxu0 %vm108_vm1, %v550_v5  ;;  %539 = vmatprep.mubr.msk.bf16.mxu1 %vm108_vm1, %v554_v8 }
   0x8   :  { %33 = vst.msk [vmem:[#allocation2 + $0x70] sm:$0xff] %vm18_vm2, %v556_v1  ;;  %34 = vst.msk [vmem:[#allocation2 + $0x78] sm:$0xff] %vm18_vm2, %v556_v1  ;;  %v37_v11 = vld [vmem:[#allocation2 + $0x10] sm:$0xff]  ;;  %v35_v12 = vld [vmem:[#allocation2] sm:$0xff] }
   0x9   :  { %v38_v14 = vld [vmem:[#allocation2 + $0x18] sm:$0xff]  ;;  %v36_v17 = vld [vmem:[#allocation2 + $0x8] sm:$0xff] }
   0xa   :  { %v39_v35 = vld [vmem:[#allocation2 + $0x20] sm:$0xff]  ;;  %v40_v41 = vld [vmem:[#allocation2 + $0x28] sm:$0xff] }
   0xb   :  { %v41_v32 = vld [vmem:[#allocation2 + $0x30] sm:$0xff]  ;;  %v42_v38 = vld [vmem:[#allocation2 + $0x38] sm:$0xff] }
   0xc   :  { %v43_v21 = vld [vmem:[#allocation2 + $0x40] sm:$0xff]  ;;  %v44_v29 = vld [vmem:[#allocation2 + $0x48] sm:$0xff] }
   0xd   :  { %v45_v18 = vld [vmem:[#allocation2 + $0x50] sm:$0xff]  ;;  %v46_v25 = vld [vmem:[#allocation2 + $0x58] sm:$0xff] }
   0xe   :  { %532 = vmatmul.mubr.msk.bf16.gmra.mrb[4].mxu0 %vm108_vm1, %v551_v9  ;;  %540 = vmatmul.mubr.msk.bf16.gmra.mrb[4].mxu1 %vm108_vm1, %v555_v10 }
  0xd9   :  { %v529_v13 = vpop.f32.mrb[0].mxu0  ;;  %v537_v24 = vpop.f32.mrb[0].mxu1 }
  0xda   :  { %v236_v15 = vadd.f32 %v529_v13, %v37_v11  ;;  %v171_v16 = vpop.f32.mrb[1].mxu0  ;;  %v244_v27 = vadd.f32 %v537_v24, %v45_v18  ;;  %v203_v28 = vpop.f32.mrb[1].mxu1 }
  0xdb   :  { %v234_v19 = vadd.f32 %v171_v16, %v35_v12  ;;  %v530_v20 = vpop.f32.mrb[2].mxu0  ;;  %v242_v30 = vadd.f32 %v203_v28, %v43_v21  ;;  %v538_v31 = vpop.f32.mrb[2].mxu1 }
  0xdc   :  { %253 = vst.msk [vmem:[#allocation2 + $0x10] sm:$0xff] %vm18_vm2, %v236_v15  ;;  %v237_v22 = vadd.f32 %v530_v20, %v38_v14  ;;  %v174_v23 = vpop.f32.mrb[3].mxu0  ;;  %261 = vst.msk [vmem:[#allocation2 + $0x50] sm:$0xff] %vm18_vm2, %v244_v27  ;;  %v245_v33 = vadd.f32 %v538_v31, %v46_v25  ;;  %v206_v34 = vpop.f32.mrb[3].mxu1 }
  0xdd   :  { %251 = vst.msk [vmem:[#allocation2] sm:$0xff] %vm18_vm2, %v234_v19  ;;  %v235_v26 = vadd.f32 %v174_v23, %v36_v17  ;;  %259 = vst.msk [vmem:[#allocation2 + $0x40] sm:$0xff] %vm18_vm2, %v242_v30  ;;  %v243_v36 = vadd.f32 %v206_v34, %v44_v29  ;;  %v47_v34 = vld [vmem:[#allocation2 + $0x60] sm:$0xff] }
  0xde   :  { %254 = vst.msk [vmem:[#allocation2 + $0x18] sm:$0xff] %vm18_vm2, %v237_v22  ;;  %262 = vst.msk [vmem:[#allocation2 + $0x58] sm:$0xff] %vm18_vm2, %v245_v33  ;;  %v49_v33 = vld [vmem:[#allocation2 + $0x70] sm:$0xff] }
  0xdf   :  { %252 = vst.msk [vmem:[#allocation2 + $0x8] sm:$0xff] %vm18_vm2, %v235_v26  ;;  %260 = vst.msk [vmem:[#allocation2 + $0x48] sm:$0xff] %vm18_vm2, %v243_v36 }
  0xe1   :  { %v533_v37 = vpop.f32.mrb[4].mxu0  ;;  %v640_v49 = vpop.f32.mrb[4].mxu1 }
  0xe2   :  { %v240_v39 = vadd.f32 %v533_v37, %v41_v32  ;;  %v187_v40 = vpop.f32.mrb[5].mxu0  ;;  %v643_v54 = vpop.f32.mrb[5].mxu1 }
  0xe3   :  { %v272_v42 = vld [vmem:[#allocation2 + $0x10] sm:$0xff]  ;;  %v238_v43 = vadd.f32 %v187_v40, %v39_v35  ;;  %v534_v44 = vpop.f32.mrb[6].mxu0  ;;  %v652_v59 = vpop.f32.mrb[6].mxu1  ;;  %v48_v40 = vld [vmem:[#allocation2 + $0x68] sm:$0xff] }
  0xe4   :  { %v502_v45 = vpack.c.bf16 %v272_v42, %v272_v42  ;;  %v270_v46 = vld [vmem:[#allocation2] sm:$0xff]  ;;  %257 = vst.msk [vmem:[#allocation2 + $0x30] sm:$0xff] %vm18_vm2, %v240_v39  ;;  %v241_v47 = vadd.f32 %v534_v44, %v42_v38  ;;  %v190_v48 = vpop.f32.mrb[7].mxu0  ;;  %v408_v55 = vmul.f32 %v272_v42, %v272_v42  ;;  %v650_v58 = vld [vmem:[#allocation2 + $0x50] sm:$0xff]  ;;  %v222_v1 = vpop.f32.mrb[7].mxu1  ;;  %v370_v6 = vsel %vm18_vm2, %v272_v42, 0.0 }
  0xe5   :  { %v500_v50 = vpack.c.bf16 %v270_v46, %v270_v46  ;;  %v406_v51 = vmul.f32 %v270_v46, %v270_v46  ;;  %v273_v52 = vld [vmem:[#allocation2 + $0x18] sm:$0xff]  ;;  %255 = vst.msk [vmem:[#allocation2 + $0x20] sm:$0xff] %vm18_vm2, %v238_v43  ;;  %v239_v53 = vadd.f32 %v190_v48, %v40_v41  ;;  %v367_v60 = vsel %vm18_vm2, %v270_v46, 0.0  ;;  %v661_v0 = vld [vmem:[#allocation2 + $0x40] sm:$0xff] }
  0xe6   :  { %353 = vst.msk [vmem:[%s788_s2 + $0x8] sm:$0xf] %vm350_vm3, %v502_v45  ;;  %v503_v56 = vpack.c.bf16 %v273_v52, %v273_v52  ;;  %v271_v57 = vld [vmem:[#allocation2 + $0x8] sm:$0xff]  ;;  %v409_v2 = vmul.f32 %v273_v52, %v273_v52  ;;  %v510_v4 = vpack.c.bf16 %v650_v58, %v650_v58  ;;  %v669_v5 = vld [vmem:[#allocation2 + $0x58] sm:$0xff]  ;;  %v508_v9 = vpack.c.bf16 %v661_v0, %v661_v0 }
  0xe7   :  { %258 = vst.msk [vmem:[#allocation2 + $0x38] sm:$0xff] %vm18_vm2, %v241_v47  ;;  %v501_v61 = vpack.c.bf16 %v271_v57, %v271_v57  ;;  %v368_v62 = vsel %vm18_vm2, %v271_v57, 0.0  ;;  %v407_v63 = vmul.f32 %v271_v57, %v271_v57  ;;  %256 = vst.msk [vmem:[#allocation2 + $0x28] sm:$0xff] %vm18_vm2, %v239_v53  ;;  %v422_v7 = vsel %vm18_vm2, %v406_v51, 0.0  ;;  %v680_v10 = vld [vmem:[#allocation2 + $0x48] sm:$0xff]  ;;  %v50_v39 = vld [vmem:[#allocation2 + $0x78] sm:$0xff] }
  0xe8   :  { %351 = vst.msk [vmem:[%s788_s2] sm:$0xf] %vm350_vm3, %v500_v50  ;;  %354 = vst.msk [vmem:[%s788_s2 + $0xc] sm:$0xf] %vm350_vm3, %v503_v56  ;;  %v369_v3 = vadd.f32 %v368_v62, %v367_v60  ;;  %v511_v13 = vpack.c.bf16 %v669_v5, %v669_v5  ;;  %v425_v14 = vsel %vm18_vm2, %v408_v55, 0.0  ;;  %v509_v16 = vpack.c.bf16 %v680_v10, %v680_v10 }
  0xe9   :  { %352 = vst.msk [vmem:[%s788_s2 + $0x4] sm:$0xf] %vm350_vm3, %v501_v61  ;;  %v423_v8 = vsel %vm18_vm2, %v407_v63, 0.0  ;;  %361 = vst.msk [vmem:[%s788_s2 + $0x28] sm:$0xf] %vm350_vm3, %v510_v4  ;;  %v372_v17 = vsel %vm18_vm2, %v273_v52, 0.0  ;;  %v414_v43 = vmul.f32 %v661_v0, %v661_v0  ;;  %v248_v46 = vadd.f32 %v640_v49, %v49_v33 }
  0xea   :  { %v371_v11 = vadd.f32 %v370_v6, %v369_v3  ;;  %v424_v12 = vadd.f32 %v423_v8, %v422_v7  ;;  %359 = vst.msk [vmem:[%s788_s2 + $0x20] sm:$0xf] %vm350_vm3, %v508_v9  ;;  %v427_v18 = vsel %vm18_vm2, %v409_v2, 0.0  ;;  %362 = vst.msk [vmem:[%s788_s2 + $0x2c] sm:$0xf] %vm350_vm3, %v511_v13  ;;  %v246_v47 = vadd.f32 %v643_v54, %v47_v34 }
  0xeb   :  { %v276_v15 = vld [vmem:[#allocation2 + $0x30] sm:$0xff]  ;;  %360 = vst.msk [vmem:[%s788_s2 + $0x24] sm:$0xf] %vm350_vm3, %v509_v16  ;;  %v249_v51 = vadd.f32 %v652_v59, %v50_v39  ;;  %v247_v52 = vadd.f32 %v222_v1, %v48_v40  ;;  %v382_v56 = vsel %vm18_vm2, %v661_v0, 0.0  ;;  %v437_v59 = vsel %vm18_vm2, %v414_v43, 0.0 }
  0xec   :  { %v426_v19 = vadd.f32 %v425_v14, %v424_v12  ;;  %v506_v20 = vpack.c.bf16 %v276_v15, %v276_v15  ;;  %v274_v21 = vld [vmem:[#allocation2 + $0x20] sm:$0xff]  ;;  %v373_v23 = vadd.f32 %v372_v17, %v371_v11  ;;  %v412_v35 = vmul.f32 %v276_v15, %v276_v15  ;;  %265 = vst.msk [vmem:[#allocation2 + $0x70] sm:$0xff] %vm18_vm2, %v248_v46 }
  0xed   :  { %v504_v22 = vpack.c.bf16 %v274_v21, %v274_v21  ;;  %v374_v24 = vsel %vm18_vm2, %v274_v21, 0.0  ;;  %v410_v25 = vmul.f32 %v274_v21, %v274_v21  ;;  %v378_v41 = vsel %vm18_vm2, %v276_v15, 0.0  ;;  %263 = vst.msk [vmem:[#allocation2 + $0x60] sm:$0xff] %vm18_vm2, %v246_v47  ;;  %266 = vst.msk [vmem:[#allocation2 + $0x78] sm:$0xff] %vm18_vm2, %v249_v51 }
  0xee   :  { %v277_v26 = vld [vmem:[#allocation2 + $0x38] sm:$0xff]  ;;  %357 = vst.msk [vmem:[%s788_s2 + $0x18] sm:$0xf] %vm350_vm3, %v506_v20  ;;  %v428_v27 = vadd.f32 %v427_v18, %v426_v19  ;;  %v275_v29 = vld [vmem:[#allocation2 + $0x28] sm:$0xff]  ;;  %v375_v30 = vadd.f32 %v374_v24, %v373_v23  ;;  %v433_v53 = vsel %vm18_vm2, %v412_v35, 0.0  ;;  %v415_v60 = vmul.f32 %v680_v10, %v680_v10 }
  0xef   :  { %v507_v28 = vpack.c.bf16 %v277_v26, %v277_v26  ;;  %355 = vst.msk [vmem:[%s788_s2 + $0x10] sm:$0xf] %vm350_vm3, %v504_v22  ;;  %v429_v31 = vsel %vm18_vm2, %v410_v25, 0.0  ;;  %v505_v32 = vpack.c.bf16 %v275_v29, %v275_v29  ;;  %v376_v37 = vsel %vm18_vm2, %v275_v29, 0.0 }
  0xf0   :  { %v430_v36 = vadd.f32 %v429_v31, %v428_v27  ;;  %v411_v38 = vmul.f32 %v275_v29, %v275_v29  ;;  %v377_v42 = vadd.f32 %v376_v37, %v375_v30  ;;  %v413_v44 = vmul.f32 %v277_v26, %v277_v26  ;;  %264 = vst.msk [vmem:[#allocation2 + $0x68] sm:$0xff] %vm18_vm2, %v247_v52 }
  0xf1   :  { %358 = vst.msk [vmem:[%s788_s2 + $0x1c] sm:$0xf] %vm350_vm3, %v507_v28  ;;  %356 = vst.msk [vmem:[%s788_s2 + $0x14] sm:$0xf] %vm350_vm3, %v505_v32  ;;  %v380_v55 = vsel %vm18_vm2, %v277_v26, 0.0  ;;  %v416_v63 = vmul.f32 %v650_v58, %v650_v58  ;;  %v384_v0 = vsel %vm18_vm2, %v680_v10, 0.0  ;;  %v417_v4 = vmul.f32 %v669_v5, %v669_v5 }
  0xf2   :  { %v431_v45 = vsel %vm18_vm2, %v411_v38, 0.0  ;;  %v379_v48 = vadd.f32 %v378_v41, %v377_v42  ;;  %v435_v54 = vsel %vm18_vm2, %v413_v44, 0.0  ;;  %v386_v3 = vsel %vm18_vm2, %v650_v58, 0.0 }
  0xf3   :  { %v432_v50 = vadd.f32 %v431_v45, %v430_v36  ;;  %v439_v6 = vsel %vm18_vm2, %v415_v60, 0.0  ;;  %v284_v9 = vld [vmem:[#allocation2 + $0x70] sm:$0xff]  ;;  %v441_v12 = vsel %vm18_vm2, %v416_v63, 0.0  ;;  %v388_v13 = vsel %vm18_vm2, %v669_v5, 0.0 }
  0xf4   :  { %v381_v49 = vadd.f32 %v380_v55, %v379_v48  ;;  %v282_v11 = vld [vmem:[#allocation2 + $0x60] sm:$0xff]  ;;  %v514_v10 = vpack.c.bf16 %v284_v9, %v284_v9  ;;  %v285_v15 = vld [vmem:[#allocation2 + $0x78] sm:$0xff]  ;;  %v443_v20 = vsel %vm18_vm2, %v417_v4, 0.0  ;;  %v420_v25 = vmul.f32 %v284_v9, %v284_v9 }
  0xf5   :  { %v434_v57 = vadd.f32 %v433_v53, %v432_v50  ;;  %v512_v14 = vpack.c.bf16 %v282_v11, %v282_v11  ;;  %v390_v18 = vsel %vm18_vm2, %v282_v11, 0.0  ;;  %v418_v19 = vmul.f32 %v282_v11, %v282_v11 }
  0xf6   :  { %v383_v61 = vadd.f32 %v382_v56, %v381_v49  ;;  %365 = vst.msk [vmem:[%s788_s2 + $0x38] sm:$0xf] %vm350_vm3, %v514_v10  ;;  %v515_v5 = vpack.c.bf16 %v285_v15, %v285_v15  ;;  %v394_v30 = vsel %vm18_vm2, %v284_v9, 0.0  ;;  %v421_v31 = vmul.f32 %v285_v15, %v285_v15 }
  0xf7   :  { %v436_v62 = vadd.f32 %v435_v54, %v434_v57  ;;  %v283_v16 = vld [vmem:[#allocation2 + $0x68] sm:$0xff]  ;;  %363 = vst.msk [vmem:[%s788_s2 + $0x30] sm:$0xf] %vm350_vm3, %v512_v14  ;;  %v445_v23 = vsel %vm18_vm2, %v418_v19, 0.0  ;;  %v449_v35 = vsel %vm18_vm2, %v420_v25, 0.0  ;;  %v396_v36 = vsel %vm18_vm2, %v285_v15, 0.0 }
  0xf8   :  { %v385_v2 = vadd.f32 %v384_v0, %v383_v61  ;;  %v513_v24 = vpack.c.bf16 %v283_v16, %v283_v16  ;;  %366 = vst.msk [vmem:[%s788_s2 + $0x3c] sm:$0xf] %vm350_vm3, %v515_v5  ;;  %v392_v26 = vsel %vm18_vm2, %v283_v16, 0.0  ;;  %v419_v27 = vmul.f32 %v283_v16, %v283_v16 }
  0xf9   :  { %v438_v1 = vadd.f32 %v437_v59, %v436_v62  ;;  %v451_v39 = vsel %vm18_vm2, %v421_v31, 0.0 }
  0xfa   :  { %v387_v7 = vadd.f32 %v386_v3, %v385_v2  ;;  %364 = vst.msk [vmem:[%s788_s2 + $0x34] sm:$0xf] %vm350_vm3, %v513_v24  ;;  %v447_v32 = vsel %vm18_vm2, %v419_v27, 0.0 }
  0xfb   :  { %v440_v8 = vadd.f32 %v439_v6, %v438_v1 }
  0xfc   :  { %v389_v58 = vadd.f32 %v388_v13, %v387_v7 }
  0xfd   :  { %v442_v17 = vadd.f32 %v441_v12, %v440_v8 }
  0xfe   :  { %v391_v21 = vadd.f32 %v390_v18, %v389_v58 }
  0xff   :  { %v444_v22 = vadd.f32 %v443_v20, %v442_v17 }
 0x100   :  { %v393_v29 = vadd.f32 %v392_v26, %v391_v21 }
 0x101   :  { %v446_v28 = vadd.f32 %v445_v23, %v444_v22 }
 0x102   :  { %v395_v33 = vadd.f32 %v394_v30, %v393_v29 }
 0x103   :  { %v448_v34 = vadd.f32 %v447_v32, %v446_v28 }
 0x104   :  { %v397_v37 = vadd.f32 %v396_v36, %v395_v33 }
 0x105   :  { %v450_v38 = vadd.f32 %v449_v35, %v448_v34 }
 0x106   :  { %v398_v40 = vrot.slane %v397_v37, 4 }
 0x107   :  { %v452_v41 = vadd.f32 %v451_v39, %v450_v38 }
 0x108   :  { %v399_v42 = vadd.f32 %v398_v40, %v397_v37 }
 0x109   :  { %v453_v43 = vrot.slane %v452_v41, 4 }
 0x10a   :  { %v400_v44 = vrot.slane %v399_v42, 2 }
 0x10b   :  { %v454_v45 = vadd.f32 %v453_v43, %v452_v41 }
 0x10c   :  { %v401_v46 = vadd.f32 %v400_v44, %v399_v42 }
 0x10d   :  { %v455_v47 = vrot.slane %v454_v45, 2 }
 0x10e   :  { %v402_v48 = vrot.slane %v401_v46, 1 }
 0x10f   :  { %v456_v50 = vadd.f32 %v455_v47, %v454_v45 }
 0x110   :  { %v403_v51 = vadd.f32 %v402_v48, %v401_v46 }
 0x111   :  { %v457_v52 = vrot.slane %v456_v50, 1 }
 0x112   :  { %405 = vst.msk [vmem:[%s789_s3] sm:$0x1] %vm404_vm4, %v403_v51 }
 0x113   :  { %v458_v53 = vadd.f32 %v457_v52, %v456_v50 }
 0x115   :  { %459 = vst.msk [vmem:[%s789_s3 + $0x1] sm:$0x1] %vm404_vm4, %v458_v53 }

// kernel: basic_block_forward.9
= control target key start
LH: loop header
LB: loop body
LE: loop exit
PB: predicated region body
PF: predicated region fallthrough
CT: control target
= control target key end

     0   :  { %v29_v0 = vlaneseq  ;;  %v183_v1 = vmov 1983009808   ;;  %s240_s0 = inlined_call_operand.vmem [shape: bf16[2,512], index: 0, kind: input, shape index: {}]   ;;  %s241_s1 = inlined_call_operand.vmem [shape: f32[1,512], index: 1, kind: input, shape index: {}]   ;;  %s242_s2 = inlined_call_operand.vmem [shape: f32[1,512], index: 2, kind: input, shape index: {}]   ;;  %s243_s4 = inlined_call_operand.vmem [shape: f32[1,512], index: 4, kind: input, shape index: {}]   ;;  %s244_s5 = inlined_call_operand.vmem [shape: f32[1,512], index: 5, kind: input, shape index: {}]   ;;  %s245_s3 = inlined_call_operand.vmem [shape: bf16[2,512], index: 3, kind: input, shape index: {}]   ;;  %s246_s6 = inlined_call_operand.vmem [shape: f32[2,512], index: 6, kind: output, shape index: {}]  }
   0x1   :  { %v48_v2 = vunpack.c.l.s4 %v183_v1  ;;  %v23_v3 = vld [vmem:[%s240_s0] sm:$0xf] }
   0x2   :  { %v30_v4 = vshrl.u32 %v29_v0, 7  ;;  %v27_v5 = vld [vmem:[%s241_s1] sm:$0xf]  ;;  %v24_v12 = vunpack.c.l.bf16 %v23_v3 }
   0x3   :  { %v49_v6 = vunpack.c.0.s8 %v48_v2  ;;  %v64_v11 = vld [vmem:[%s242_s2] sm:$0xf] }
   0x4   :  { %v31_v7 = vsub.s32 0, %v30_v4  ;;  %v35_v8 = vsub.s32 1, %v30_v4  ;;  %v39_v9 = vsub.s32 2, %v30_v4  ;;  %v43_v10 = vsub.s32 3, %v30_v4  ;;  %v101_v14 = vld [vmem:[%s243_s4] sm:$0xf] }
   0x5   :  { %v52_v13 = vsub.s32 %v49_v6, %v30_v4  ;;  %v139_v23 = vld [vmem:[%s244_s5] sm:$0xf] }
   0x6   :  { %v32_v15 = vrot.slane %v27_v5, %v31_v7  ;;  %v36_v16 = vrot.slane %v27_v5, %v35_v8  ;;  %v40_v17 = vrot.slane %v27_v5, %v39_v9  ;;  %v44_v18 = vrot.slane %v27_v5, %v43_v10  ;;  %v25_v32 = vld [vmem:[%s245_s3] sm:$0xf] }
   0x7   :  { %v69_v19 = vrot.slane %v64_v11, %v31_v7  ;;  %v73_v20 = vrot.slane %v64_v11, %v35_v8  ;;  %v77_v21 = vrot.slane %v64_v11, %v39_v9  ;;  %v81_v22 = vrot.slane %v64_v11, %v43_v10 }
   0x8   :  { %v45_v24 = vcombine.low %v32_v15, %v36_v16  ;;  %v46_v25 = vcombine.low %v40_v17, %v44_v18  ;;  %v106_v26 = vrot.slane %v101_v14, %v31_v7  ;;  %v110_v27 = vrot.slane %v101_v14, %v35_v8 }
   0x9   :  { %v82_v28 = vcombine.low %v69_v19, %v73_v20  ;;  %v83_v29 = vcombine.low %v77_v21, %v81_v22  ;;  %v114_v30 = vrot.slane %v101_v14, %v39_v9  ;;  %v118_v31 = vrot.slane %v101_v14, %v43_v10 }
   0xa   :  { %v53_v33 = vrot.slane %v45_v24, %v52_v13  ;;  %v60_v34 = vrot.slane %v46_v25, %v52_v13  ;;  %v119_v35 = vcombine.low %v106_v26, %v110_v27  ;;  %v144_v36 = vrot.slane %v139_v23, %v31_v7 }
   0xb   :  { %v90_v37 = vrot.slane %v82_v28, %v52_v13  ;;  %v97_v38 = vrot.slane %v83_v29, %v52_v13  ;;  %v120_v39 = vcombine.low %v114_v30, %v118_v31  ;;  %v148_v40 = vrot.slane %v139_v23, %v35_v8 }
   0xc   :  { %v61_v41 = vcombine.low %v53_v33, %v60_v34  ;;  %v127_v42 = vrot.slane %v119_v35, %v52_v13  ;;  %v152_v43 = vrot.slane %v139_v23, %v39_v9  ;;  %v156_v44 = vrot.slane %v139_v23, %v43_v10 }
   0xd   :  { %v26_v45 = vunpack.c.l.bf16 %v25_v32  ;;  %v98_v46 = vcombine.low %v90_v37, %v97_v38  ;;  %v134_v47 = vrot.slane %v120_v39, %v52_v13  ;;  %v157_v48 = vcombine.low %v144_v36, %v148_v40 }
   0xe   :  { %v63_v49 = vmul.f32 %v61_v41, %v24_v12  ;;  %v158_v50 = vcombine.low %v152_v43, %v156_v44 }
   0xf   :  { %v135_v51 = vcombine.low %v127_v42, %v134_v47  ;;  %v165_v52 = vrot.slane %v157_v48, %v52_v13 }
  0x10   :  { %v100_v53 = vadd.f32 %v98_v46, %v63_v49  ;;  %v172_v54 = vrot.slane %v158_v50, %v52_v13 }
  0x11   :  { %v137_v55 = vmul.f32 %v135_v51, %v26_v45 }
  0x12   :  { %v173_v56 = vcombine.low %v165_v52, %v172_v54 }
  0x13   :  { %v138_v57 = vadd.f32 %v137_v55, %v100_v53 }
  0x15   :  { %v175_v58 = vadd.f32 %v173_v56, %v138_v57 }
  0x17   :  { %v176_v59 = vmax.f32 %v175_v58, 0.0 }
  0x19   :  { %177 = vst [vmem:[%s246_s6] sm:$0xff] %v176_v59 }

</bundles_post_ra>
